<compile_context>
chip_gen: v7x
topology: tpu7x:2x2x1
jax: 0.10.0
libtpu: 0.0.40
codegen_flags: <defaults>
</compile_context>

<pallas_src>
import functools

import jax
import jax.numpy as jnp
from jax.experimental import pallas as pl
from jax.experimental.pallas import tpu as pltpu


def _relu6(x):
    return jnp.clip(x, 0.0, 6.0)


def _make_kernel(H, W, Cin, hidden, Cout, k, stride, pad, use_shortcut, t, margin):
    HW = H * W
    Ho = (H + 2 * pad - k) // stride + 1
    Wo = (W + 2 * pad - k) // stride + 1

    def kernel(x_ref, col_ref, w1_ref, b1_ref, dw_ref, bdw_ref, w2_ref, b2_ref,
               o_ref, hp_ref):
        x = x_ref[0]  # (Cin, HW), f32, spatial flattened onto lanes

        # ---- stage 1: 1x1 expand conv (channel matmul on the MXU) + BN + ReLU6
        if t != 1:
            h = jnp.dot(w1_ref[...], x, preferred_element_type=jnp.float32)
            h = _relu6(h + b1_ref[...])          # bias is a (hidden, 1) column
        else:
            h = x

        # ---- stage 2: depthwise kxk conv + BN + ReLU6
        # Stage the activation through a flat (hidden, margin + HW + margin)
        # scratch.  Interior store is lane-aligned (offset = margin, a multiple
        # of 128); each tap is a statically offset lane-shifted read.  Zero
        # margins provide the vertical (row) zero padding; horizontal border
        # taps are killed with precomputed lane-index column masks.
        zeros_margin = jnp.zeros((hidden, margin), jnp.float32)
        hp_ref[:, pl.ds(0, margin)] = zeros_margin
        hp_ref[:, pl.ds(margin + HW, margin)] = zeros_margin
        hp_ref[:, pl.ds(margin, HW)] = h

        # per-lane column index (x coordinate), (1, HW) int32; masks broadcast
        # over the channel (sublane) axis for free and are hoisted out of the
        # tap loops.
        col = col_ref[...]
        col_mask = {}
        for dx in range(-pad, pad + 1):
            if dx < 0:
                col_mask[dx] = col >= -dx
            elif dx > 0:
                col_mask[dx] = col < W - dx
            else:
                col_mask[dx] = None

        # Group taps by dx so each column mask is applied once per group.
        acc = None
        for kx in range(k):
            dx = kx - pad
            part = None
            for ky in range(k):
                dy = ky - pad
                shift = dy * W + dx
                # patch[c, y*W + x] = h[c, (y+dy)*W + (x+dx)]  (zeros in margins)
                patch = hp_ref[:, pl.ds(margin + shift, HW)]
                w_col = dw_ref[ky * k + kx]      # (hidden, 1) per-channel tap
                tap = patch * w_col
                part = tap if part is None else part + tap
            if col_mask[dx] is not None:
                part = jnp.where(col_mask[dx], part, 0.0)
            acc = part if acc is None else acc + part
        acc = _relu6(acc + bdw_ref[...])

        if stride != 1:
            # TODO(synk): stride>1 subsamples the full-resolution depthwise output
            # via an in-register relayout; correct but not perf-tuned.
            acc = acc.reshape(hidden, H, W)[:, ::stride, ::stride].reshape(hidden, Ho * Wo)

        # ---- stage 3: 1x1 project conv + BN (linear bottleneck, no activation)
        out = jnp.dot(w2_ref[...], acc, preferred_element_type=jnp.float32) + b2_ref[...]
        if use_shortcut:
            out = out + x
        o_ref[0] = out.astype(o_ref.dtype)       # lane-dense (Cout, Ho*Wo) store

    return kernel, Ho, Wo


def linear_bottleneck_pallas(x_nchw, params, *, kernel_size, stride, t, use_shortcut):
    # NCHW in / NCHW out; only free contiguous reshapes, no wrapper transposes.
    x = x_nchw.astype(jnp.float32)
    N, Cin, H, W = x.shape
    HW = H * W
    w1, b1, dw, bdw, w2, b2 = params
    Cout, hidden = w2.shape
    pad = (kernel_size - 1) // 2

    # lane-aligned zero margin wide enough for the largest flat tap shift
    margin = max(128, ((pad * (W + 1) + 127) // 128) * 128)

    kernel, Ho, Wo = _make_kernel(H, W, Cin, hidden, Cout, kernel_size, stride,
                                  pad, use_shortcut, t, margin)

    # per-lane column index (x coordinate) for the horizontal border masks
    col_idx = jnp.tile(jnp.arange(W, dtype=jnp.int32), H).reshape(1, HW)

    def const_spec(shape):
        return pl.BlockSpec(shape, lambda n, _nd=len(shape): (0,) * _nd)

    out = pl.pallas_call(
        kernel,
        out_shape=jax.ShapeDtypeStruct((N, Cout, Ho * Wo), jnp.float32),
        grid=(N,),
        in_specs=[
            pl.BlockSpec((1, Cin, HW), lambda n: (n, 0, 0)),
            const_spec(col_idx.shape),
            const_spec(w1.shape),
            const_spec(b1.shape),
            const_spec(dw.shape),
            const_spec(bdw.shape),
            const_spec(w2.shape),
            const_spec(b2.shape),
        ],
        out_specs=pl.BlockSpec((1, Cout, Ho * Wo), lambda n: (n, 0, 0)),
        scratch_shapes=[pltpu.VMEM((hidden, HW + 2 * margin), jnp.float32)],
        # keep the batch on a "parallel" grid axis so both v7x TensorCores are
        # used; on single-TC v5e/v6e this costs one ~0.35us pipeline step.
        compiler_params=pltpu.CompilerParams(dimension_semantics=("parallel",)),
    )(x.reshape(N, Cin, HW), col_idx, w1, b1, dw, bdw, w2, b2)
    return out.reshape(N, Cout, Ho, Wo)


def init_params(key, in_channels, channels, t, kernel_size):
    """Deterministic params with eval-mode BN folded in, stored in kernel layout."""
    hidden = in_channels * t
    ks = jax.random.split(key, 15)

    def bn_fold(kg, kb, km, kv, c):
        gamma = jax.random.uniform(kg, (c,), minval=0.5, maxval=1.5)
        beta = 0.1 * jax.random.normal(kb, (c,))
        mean = 0.1 * jax.random.normal(km, (c,))
        var = jax.random.uniform(kv, (c,), minval=0.5, maxval=1.5)
        scale = gamma / jnp.sqrt(var + 1e-5)
        shift = beta - mean * scale
        return scale, shift

    # 1x1 expand conv, pre-transposed to (hidden, Cin): stage 1 is w1 @ x.
    w1 = 0.1 * jax.random.normal(ks[0], (hidden, in_channels), jnp.float32)
    s1, sh1 = bn_fold(ks[1], ks[2], ks[3], ks[4], hidden)
    w1 = w1 * s1[:, None]
    b1 = sh1.reshape(hidden, 1)

    # depthwise conv taps as (k*k, hidden, 1) per-channel (sublane) columns.
    dw = 0.1 * jax.random.normal(ks[5], (kernel_size * kernel_size, hidden), jnp.float32)
    sdw, shdw = bn_fold(ks[6], ks[7], ks[8], ks[9], hidden)
    dw = (dw * sdw[None, :]).reshape(kernel_size * kernel_size, hidden, 1)
    bdw = shdw.reshape(hidden, 1)

    # 1x1 project conv, pre-transposed to (channels, hidden): stage 3 is w2 @ acc.
    w2 = 0.1 * jax.random.normal(ks[10], (channels, hidden), jnp.float32)
    s2, sh2 = bn_fold(ks[11], ks[12], ks[13], ks[14], channels)
    w2 = w2 * s2[:, None]
    b2 = sh2.reshape(channels, 1)

    return w1, b1, dw, bdw, w2, b2


def reference(x_nchw, params, *, kernel_size, stride, t, use_shortcut):
    """Pure-JAX NCHW reference with identical folded-BN math (for validation)."""
    x = x_nchw.astype(jnp.float32)
    w1, b1, dw, bdw, w2, b2 = params
    N, Cin, H, W = x.shape
    k = kernel_size
    pad = (k - 1) // 2
    hidden = w2.shape[1]
    Ho = (H + 2 * pad - k) // stride + 1
    Wo = (W + 2 * pad - k) // stride + 1

    if t != 1:
        h = _relu6(jnp.einsum("dc,nchw->ndhw", w1, x) + b1.reshape(1, hidden, 1, 1))
    else:
        h = x
    hp = jnp.pad(h, ((0, 0), (0, 0), (pad, pad), (pad, pad)))
    taps = dw.reshape(k, k, hidden)
    acc = jnp.zeros((N, hidden, Ho, Wo), jnp.float32)
    for ky in range(k):
        for kx in range(k):
            patch = hp[:, :, ky:ky + (Ho - 1) * stride + 1:stride,
                       kx:kx + (Wo - 1) * stride + 1:stride]
            acc = acc + patch * taps[ky, kx].reshape(1, hidden, 1, 1)
    acc = _relu6(acc + bdw.reshape(1, hidden, 1, 1))
    out = jnp.einsum("dc,nchw->ndhw", w2, acc) + b2.reshape(1, -1, 1, 1)
    if use_shortcut:
        out = out + x
    return out


if __name__ == "__main__":
    # Module config: LinearBottleneck(kernel_size=3, in_channels=8, channels=8, t=4, stride=1)
    kernel_size, in_channels, channels, t, stride = 3, 8, 8, 4, 1
    use_shortcut = (stride == 1 and in_channels == channels)
    N, H, W = 2, 16, 16

    root = jax.random.PRNGKey(0)
    kx_, kp = jax.random.split(root)
    x = jax.random.normal(kx_, (N, in_channels, H, W), jnp.float32)  # NCHW input
    params = init_params(kp, in_channels, channels, t, kernel_size)

    run = functools.partial(linear_bottleneck_pallas, kernel_size=kernel_size,
                            stride=stride, t=t, use_shortcut=use_shortcut)
    out = jax.block_until_ready(run(x, params))

    ref = reference(x, params, kernel_size=kernel_size, stride=stride, t=t,
                    use_shortcut=use_shortcut)
    assert out.shape == (N, channels, H, W), out.shape
    assert jnp.allclose(out, ref, atol=1e-4, rtol=1e-4), float(jnp.max(jnp.abs(out - ref)))
    print("KERNEL_OK")
</pallas_src>

<mosaic_0001>
module attributes {stable_mosaic.version = 11 : i64} {
  func.func @kernel(%arg0: i32, %arg1: memref<1x8x256xf32, #tpu.memory_space<vmem>>, %arg2: memref<1x256xi32, #tpu.memory_space<vmem>>, %arg3: memref<32x8xf32, #tpu.memory_space<vmem>>, %arg4: memref<32x1xf32, #tpu.memory_space<vmem>>, %arg5: memref<9x32x1xf32, #tpu.memory_space<vmem>>, %arg6: memref<32x1xf32, #tpu.memory_space<vmem>>, %arg7: memref<8x32xf32, #tpu.memory_space<vmem>>, %arg8: memref<8x1xf32, #tpu.memory_space<vmem>>, %arg9: memref<1x8x256xf32, #tpu.memory_space<vmem>>, %arg10: memref<32x512xf32, #tpu.memory_space<vmem>>) attributes {dimension_semantics = [#tpu.dimension_semantics<parallel>], iteration_bounds = array<i64: 2>, scalar_prefetch = 0 : i64, scratch_operands = 1 : i64, tpu.core_type = #tpu.core_type<tc>, window_params = [{transform_indices = @transform_0, window_bounds = array<i64: 1, 8, 256>}, {pipeline_mode = #tpu.pipeline_mode<synchronous>, transform_indices = @transform_1, window_bounds = array<i64: 1, 256>}, {pipeline_mode = #tpu.pipeline_mode<synchronous>, transform_indices = @transform_2, window_bounds = array<i64: 32, 8>}, {pipeline_mode = #tpu.pipeline_mode<synchronous>, transform_indices = @transform_3, window_bounds = array<i64: 32, 1>}, {pipeline_mode = #tpu.pipeline_mode<synchronous>, transform_indices = @transform_4, window_bounds = array<i64: 9, 32, 1>}, {pipeline_mode = #tpu.pipeline_mode<synchronous>, transform_indices = @transform_5, window_bounds = array<i64: 32, 1>}, {pipeline_mode = #tpu.pipeline_mode<synchronous>, transform_indices = @transform_6, window_bounds = array<i64: 8, 32>}, {pipeline_mode = #tpu.pipeline_mode<synchronous>, transform_indices = @transform_7, window_bounds = array<i64: 8, 1>}, {transform_indices = @transform_8, window_bounds = array<i64: 1, 8, 256>}]} {
    %c0 = arith.constant 0 : index
    %c0_0 = arith.constant 0 : index
    %c0_1 = arith.constant 0 : index
    %0 = vector.load %arg1[%c0, %c0_0, %c0_1] : memref<1x8x256xf32, #tpu.memory_space<vmem>>, vector<1x8x256xf32>
    %1 = vector.shape_cast %0 : vector<1x8x256xf32> to vector<8x256xf32>
    %c0_2 = arith.constant 0 : index
    %c0_3 = arith.constant 0 : index
    %2 = vector.load %arg3[%c0_2, %c0_3] : memref<32x8xf32, #tpu.memory_space<vmem>>, vector<32x8xf32>
    %cst = arith.constant dense<0.000000e+00> : vector<32x256xf32>
    %3 = tpu.matmul %2, %1, %cst {dimension_numbers = #tpu.dot_dimension_numbers<[1], [0], [0], [1], [0, 0, 1, 1], [], []>} : vector<32x8xf32>, vector<8x256xf32>, vector<32x256xf32> -> vector<32x256xf32>
    %c0_4 = arith.constant 0 : index
    %c0_5 = arith.constant 0 : index
    %4 = vector.load %arg4[%c0_4, %c0_5] : memref<32x1xf32, #tpu.memory_space<vmem>>, vector<32x1xf32>
    %5 = vector.broadcast %4 : vector<32x1xf32> to vector<32x256xf32>
    %6 = arith.addf %3, %5 : vector<32x256xf32>
    %cst_6 = arith.constant 0.000000e+00 : f32
    %cst_7 = arith.constant 6.000000e+00 : f32
    %7 = vector.broadcast %cst_6 : f32 to vector<32x256xf32>
    %8 = arith.maximumf %7, %6 : vector<32x256xf32>
    %9 = vector.broadcast %cst_7 : f32 to vector<32x256xf32>
    %10 = arith.minimumf %9, %8 : vector<32x256xf32>
    %cst_8 = arith.constant 0.000000e+00 : f32
    %11 = vector.broadcast %cst_8 : f32 to vector<32x128xf32>
    %c0_9 = arith.constant 0 : index
    %c0_10 = arith.constant 0 : index
    %12 = vector.load %arg10[%c0_9, %c0_10] : memref<32x512xf32, #tpu.memory_space<vmem>>, vector<32x128xf32>
    tpu.vector_store %arg10[%c0_9, %c0_10], %11 {strides = array<i32>} : memref<32x512xf32, #tpu.memory_space<vmem>>, vector<32x128xf32>,
    %c0_11 = arith.constant 0 : index
    %c384 = arith.constant 384 : index
    %13 = vector.load %arg10[%c0_11, %c384] : memref<32x512xf32, #tpu.memory_space<vmem>>, vector<32x128xf32>
    tpu.vector_store %arg10[%c0_11, %c384], %11 {strides = array<i32>} : memref<32x512xf32, #tpu.memory_space<vmem>>, vector<32x128xf32>,
    %c0_12 = arith.constant 0 : index
    %c128 = arith.constant 128 : index
    %14 = vector.load %arg10[%c0_12, %c128] : memref<32x512xf32, #tpu.memory_space<vmem>>, vector<32x256xf32>
    tpu.vector_store %arg10[%c0_12, %c128], %10 {strides = array<i32>} : memref<32x512xf32, #tpu.memory_space<vmem>>, vector<32x256xf32>,
    %c0_13 = arith.constant 0 : index
    %c0_14 = arith.constant 0 : index
    %15 = vector.load %arg2[%c0_13, %c0_14] : memref<1x256xi32, #tpu.memory_space<vmem>>, vector<1x256xi32>
    %c1_i32 = arith.constant 1 : i32
    %16 = vector.broadcast %c1_i32 : i32 to vector<1x256xi32>
    %17 = arith.cmpi sge, %15, %16 : vector<1x256xi32>
    %c15_i32 = arith.constant 15 : i32
    %18 = vector.broadcast %c15_i32 : i32 to vector<1x256xi32>
    %19 = arith.cmpi slt, %15, %18 : vector<1x256xi32>
    %c0_15 = arith.constant 0 : index
    %c111 = arith.constant 111 : index
    %20 = vector.load %arg10[%c0_15, %c111] : memref<32x512xf32, #tpu.memory_space<vmem>>, vector<32x256xf32>
    %c0_16 = arith.constant 0 : index
    %c0_17 = arith.constant 0 : index
    %c0_18 = arith.constant 0 : index
    %21 = vector.load %arg5[%c0_16, %c0_17, %c0_18] : memref<9x32x1xf32, #tpu.memory_space<vmem>>, vector<1x32x1xf32>
    %22 = vector.shape_cast %21 : vector<1x32x1xf32> to vector<32x1xf32>
    %23 = vector.broadcast %22 : vector<32x1xf32> to vector<32x256xf32>
    %24 = arith.mulf %20, %23 : vector<32x256xf32>
    %c0_19 = arith.constant 0 : index
    %c127 = arith.constant 127 : index
    %25 = vector.load %arg10[%c0_19, %c127] : memref<32x512xf32, #tpu.memory_space<vmem>>, vector<32x256xf32>
    %c3 = arith.constant 3 : index
    %c0_20 = arith.constant 0 : index
    %c0_21 = arith.constant 0 : index
    %26 = vector.load %arg5[%c3, %c0_20, %c0_21] : memref<9x32x1xf32, #tpu.memory_space<vmem>>, vector<1x32x1xf32>
    %27 = vector.shape_cast %26 : vector<1x32x1xf32> to vector<32x1xf32>
    %28 = vector.broadcast %27 : vector<32x1xf32> to vector<32x256xf32>
    %29 = arith.mulf %25, %28 : vector<32x256xf32>
    %30 = arith.addf %24, %29 : vector<32x256xf32>
    %c0_22 = arith.constant 0 : index
    %c143 = arith.constant 143 : index
    %31 = vector.load %arg10[%c0_22, %c143] : memref<32x512xf32, #tpu.memory_space<vmem>>, vector<32x256xf32>
    %c6 = arith.constant 6 : index
    %c0_23 = arith.constant 0 : index
    %c0_24 = arith.constant 0 : index
    %32 = vector.load %arg5[%c6, %c0_23, %c0_24] : memref<9x32x1xf32, #tpu.memory_space<vmem>>, vector<1x32x1xf32>
    %33 = vector.shape_cast %32 : vector<1x32x1xf32> to vector<32x1xf32>
    %34 = vector.broadcast %33 : vector<32x1xf32> to vector<32x256xf32>
    %35 = arith.mulf %31, %34 : vector<32x256xf32>
    %36 = arith.addf %30, %35 : vector<32x256xf32>
    %cst_25 = arith.constant 0.000000e+00 : f32
    %37 = vector.shape_cast %17 : vector<1x256xi1> to vector<1x256xi1>
    %38 = vector.broadcast %37 : vector<1x256xi1> to vector<32x256xi1>
    %39 = vector.broadcast %cst_25 : f32 to vector<32x256xf32>
    %40 = arith.select %38, %36, %39 : vector<32x256xi1>, vector<32x256xf32>
    %c0_26 = arith.constant 0 : index
    %c112 = arith.constant 112 : index
    %41 = vector.load %arg10[%c0_26, %c112] : memref<32x512xf32, #tpu.memory_space<vmem>>, vector<32x256xf32>
    %c1 = arith.constant 1 : index
    %c0_27 = arith.constant 0 : index
    %c0_28 = arith.constant 0 : index
    %42 = vector.load %arg5[%c1, %c0_27, %c0_28] : memref<9x32x1xf32, #tpu.memory_space<vmem>>, vector<1x32x1xf32>
    %43 = vector.shape_cast %42 : vector<1x32x1xf32> to vector<32x1xf32>
    %44 = vector.broadcast %43 : vector<32x1xf32> to vector<32x256xf32>
    %45 = arith.mulf %41, %44 : vector<32x256xf32>
    %c0_29 = arith.constant 0 : index
    %c128_30 = arith.constant 128 : index
    %46 = vector.load %arg10[%c0_29, %c128_30] : memref<32x512xf32, #tpu.memory_space<vmem>>, vector<32x256xf32>
    %c4 = arith.constant 4 : index
    %c0_31 = arith.constant 0 : index
    %c0_32 = arith.constant 0 : index
    %47 = vector.load %arg5[%c4, %c0_31, %c0_32] : memref<9x32x1xf32, #tpu.memory_space<vmem>>, vector<1x32x1xf32>
    %48 = vector.shape_cast %47 : vector<1x32x1xf32> to vector<32x1xf32>
    %49 = vector.broadcast %48 : vector<32x1xf32> to vector<32x256xf32>
    %50 = arith.mulf %46, %49 : vector<32x256xf32>
    %51 = arith.addf %45, %50 : vector<32x256xf32>
    %c0_33 = arith.constant 0 : index
    %c144 = arith.constant 144 : index
    %52 = vector.load %arg10[%c0_33, %c144] : memref<32x512xf32, #tpu.memory_space<vmem>>, vector<32x256xf32>
    %c7 = arith.constant 7 : index
    %c0_34 = arith.constant 0 : index
    %c0_35 = arith.constant 0 : index
    %53 = vector.load %arg5[%c7, %c0_34, %c0_35] : memref<9x32x1xf32, #tpu.memory_space<vmem>>, vector<1x32x1xf32>
    %54 = vector.shape_cast %53 : vector<1x32x1xf32> to vector<32x1xf32>
    %55 = vector.broadcast %54 : vector<32x1xf32> to vector<32x256xf32>
    %56 = arith.mulf %52, %55 : vector<32x256xf32>
    %57 = arith.addf %51, %56 : vector<32x256xf32>
    %58 = arith.addf %40, %57 : vector<32x256xf32>
    %c0_36 = arith.constant 0 : index
    %c113 = arith.constant 113 : index
    %59 = vector.load %arg10[%c0_36, %c113] : memref<32x512xf32, #tpu.memory_space<vmem>>, vector<32x256xf32>
    %c2 = arith.constant 2 : index
    %c0_37 = arith.constant 0 : index
    %c0_38 = arith.constant 0 : index
    %60 = vector.load %arg5[%c2, %c0_37, %c0_38] : memref<9x32x1xf32, #tpu.memory_space<vmem>>, vector<1x32x1xf32>
    %61 = vector.shape_cast %60 : vector<1x32x1xf32> to vector<32x1xf32>
    %62 = vector.broadcast %61 : vector<32x1xf32> to vector<32x256xf32>
    %63 = arith.mulf %59, %62 : vector<32x256xf32>
    %c0_39 = arith.constant 0 : index
    %c129 = arith.constant 129 : index
    %64 = vector.load %arg10[%c0_39, %c129] : memref<32x512xf32, #tpu.memory_space<vmem>>, vector<32x256xf32>
    %c5 = arith.constant 5 : index
    %c0_40 = arith.constant 0 : index
    %c0_41 = arith.constant 0 : index
    %65 = vector.load %arg5[%c5, %c0_40, %c0_41] : memref<9x32x1xf32, #tpu.memory_space<vmem>>, vector<1x32x1xf32>
    %66 = vector.shape_cast %65 : vector<1x32x1xf32> to vector<32x1xf32>
    %67 = vector.broadcast %66 : vector<32x1xf32> to vector<32x256xf32>
    %68 = arith.mulf %64, %67 : vector<32x256xf32>
    %69 = arith.addf %63, %68 : vector<32x256xf32>
    %c0_42 = arith.constant 0 : index
    %c145 = arith.constant 145 : index
    %70 = vector.load %arg10[%c0_42, %c145] : memref<32x512xf32, #tpu.memory_space<vmem>>, vector<32x256xf32>
    %c8 = arith.constant 8 : index
    %c0_43 = arith.constant 0 : index
    %c0_44 = arith.constant 0 : index
    %71 = vector.load %arg5[%c8, %c0_43, %c0_44] : memref<9x32x1xf32, #tpu.memory_space<vmem>>, vector<1x32x1xf32>
    %72 = vector.shape_cast %71 : vector<1x32x1xf32> to vector<32x1xf32>
    %73 = vector.broadcast %72 : vector<32x1xf32> to vector<32x256xf32>
    %74 = arith.mulf %70, %73 : vector<32x256xf32>
    %75 = arith.addf %69, %74 : vector<32x256xf32>
    %cst_45 = arith.constant 0.000000e+00 : f32
    %76 = vector.shape_cast %19 : vector<1x256xi1> to vector<1x256xi1>
    %77 = vector.broadcast %76 : vector<1x256xi1> to vector<32x256xi1>
    %78 = vector.broadcast %cst_45 : f32 to vector<32x256xf32>
    %79 = arith.select %77, %75, %78 : vector<32x256xi1>, vector<32x256xf32>
    %80 = arith.addf %58, %79 : vector<32x256xf32>
    %c0_46 = arith.constant 0 : index
    %c0_47 = arith.constant 0 : index
    %81 = vector.load %arg6[%c0_46, %c0_47] : memref<32x1xf32, #tpu.memory_space<vmem>>, vector<32x1xf32>
    %82 = vector.broadcast %81 : vector<32x1xf32> to vector<32x256xf32>
    %83 = arith.addf %80, %82 : vector<32x256xf32>
    %cst_48 = arith.constant 0.000000e+00 : f32
    %cst_49 = arith.constant 6.000000e+00 : f32
    %84 = vector.broadcast %cst_48 : f32 to vector<32x256xf32>
    %85 = arith.maximumf %84, %83 : vector<32x256xf32>
    %86 = vector.broadcast %cst_49 : f32 to vector<32x256xf32>
    %87 = arith.minimumf %86, %85 : vector<32x256xf32>
    %c0_50 = arith.constant 0 : index
    %c0_51 = arith.constant 0 : index
    %88 = vector.load %arg7[%c0_50, %c0_51] : memref<8x32xf32, #tpu.memory_space<vmem>>, vector<8x32xf32>
    %cst_52 = arith.constant dense<0.000000e+00> : vector<8x256xf32>
    %89 = tpu.matmul %88, %87, %cst_52 {dimension_numbers = #tpu.dot_dimension_numbers<[1], [0], [0], [1], [0, 0, 1, 1], [], []>} : vector<8x32xf32>, vector<32x256xf32>, vector<8x256xf32> -> vector<8x256xf32>
    %c0_53 = arith.constant 0 : index
    %c0_54 = arith.constant 0 : index
    %90 = vector.load %arg8[%c0_53, %c0_54] : memref<8x1xf32, #tpu.memory_space<vmem>>, vector<8x1xf32>
    %91 = vector.broadcast %90 : vector<8x1xf32> to vector<8x256xf32>
    %92 = arith.addf %89, %91 : vector<8x256xf32>
    %93 = arith.addf %92, %1 : vector<8x256xf32>
    %c0_55 = arith.constant 0 : index
    %c0_56 = arith.constant 0 : index
    %c0_57 = arith.constant 0 : index
    %94 = vector.load %arg9[%c0_55, %c0_56, %c0_57] : memref<1x8x256xf32, #tpu.memory_space<vmem>>, vector<1x8x256xf32>
    %95 = vector.shape_cast %94 : vector<1x8x256xf32> to vector<8x256xf32>
    %96 = vector.shape_cast %93 : vector<8x256xf32> to vector<1x8x256xf32>
    tpu.vector_store %arg9[%c0_55, %c0_56, %c0_57], %96 {strides = array<i32>} : memref<1x8x256xf32, #tpu.memory_space<vmem>>, vector<1x8x256xf32>,
    return
  }
  func.func @transform_0(%arg0: i32) -> (i32, i32, i32) {
    %c0_i32 = arith.constant 0 : i32
    %c0_i32_0 = arith.constant 0 : i32
    %c0_i32_1 = arith.constant 0 : i32
    return %arg0, %c0_i32, %c0_i32_0 : i32, i32, i32
  }
  func.func @transform_1(%arg0: i32) -> (i32, i32) {
    %c0_i32 = arith.constant 0 : i32
    %c0_i32_0 = arith.constant 0 : i32
    %c0_i32_1 = arith.constant 0 : i32
    return %c0_i32, %c0_i32_0 : i32, i32
  }
  func.func @transform_2(%arg0: i32) -> (i32, i32) {
    %c0_i32 = arith.constant 0 : i32
    %c0_i32_0 = arith.constant 0 : i32
    %c0_i32_1 = arith.constant 0 : i32
    return %c0_i32, %c0_i32_0 : i32, i32
  }
  func.func @transform_3(%arg0: i32) -> (i32, i32) {
    %c0_i32 = arith.constant 0 : i32
    %c0_i32_0 = arith.constant 0 : i32
    %c0_i32_1 = arith.constant 0 : i32
    return %c0_i32, %c0_i32_0 : i32, i32
  }
  func.func @transform_4(%arg0: i32) -> (i32, i32, i32) {
    %c0_i32 = arith.constant 0 : i32
    %c0_i32_0 = arith.constant 0 : i32
    %c0_i32_1 = arith.constant 0 : i32
    %c0_i32_2 = arith.constant 0 : i32
    return %c0_i32, %c0_i32_0, %c0_i32_1 : i32, i32, i32
  }
  func.func @transform_5(%arg0: i32) -> (i32, i32) {
    %c0_i32 = arith.constant 0 : i32
    %c0_i32_0 = arith.constant 0 : i32
    %c0_i32_1 = arith.constant 0 : i32
    return %c0_i32, %c0_i32_0 : i32, i32
  }
  func.func @transform_6(%arg0: i32) -> (i32, i32) {
    %c0_i32 = arith.constant 0 : i32
    %c0_i32_0 = arith.constant 0 : i32
    %c0_i32_1 = arith.constant 0 : i32
    return %c0_i32, %c0_i32_0 : i32, i32
  }
  func.func @transform_7(%arg0: i32) -> (i32, i32) {
    %c0_i32 = arith.constant 0 : i32
    %c0_i32_0 = arith.constant 0 : i32
    %c0_i32_1 = arith.constant 0 : i32
    return %c0_i32, %c0_i32_0 : i32, i32
  }
  func.func @transform_8(%arg0: i32) -> (i32, i32, i32) {
    %c0_i32 = arith.constant 0 : i32
    %c0_i32_0 = arith.constant 0 : i32
    %c0_i32_1 = arith.constant 0 : i32
    return %arg0, %c0_i32, %c0_i32_0 : i32, i32, i32
  }
}

</mosaic_0001>

<bundles_post_ra>
// kernel: tpu_custom_call.1
= control target key start
LH: loop header
LB: loop body
LE: loop exit
PB: predicated region body
PF: predicated region fallthrough
CT: control target
= control target key end

     0   :  { %13 = vsyncpa [#allocation4], 0  ;;  %s2714_s0 = inlined_call_operand.vmem [shape: f32[2,8,256], index: 0, kind: input, shape index: {}]   ;;  %s2715_s1 = inlined_call_operand.vmem [shape: s32[1,256], index: 1, kind: input, shape index: {}]   ;;  %s2716_s2 = inlined_call_operand.vmem [shape: f32[32,8], index: 2, kind: input, shape index: {}]   ;;  %s2717_s3 = inlined_call_operand.vmem [shape: f32[32,1], index: 3, kind: input, shape index: {}]   ;;  %s2718_s4 = inlined_call_operand.vmem [shape: f32[9,32,1], index: 4, kind: input, shape index: {}]   ;;  %s2719_s5 = inlined_call_operand.vmem [shape: f32[32,1], index: 5, kind: input, shape index: {}]   ;;  %s2720_s6 = inlined_call_operand.vmem [shape: f32[8,32], index: 6, kind: input, shape index: {}]   ;;  %s2721_s7 = inlined_call_operand.vmem [shape: f32[8,1], index: 7, kind: input, shape index: {}]   ;;  %s2722_s8 = inlined_call_operand.hbm [shape: f32[2,8,256], index: 8, kind: output, shape index: {}]  }
   0x1   :  { %15 = vsyncpa [#allocation4 + $0x1], 0  ;;  %s1864_s27 = smov 0   ;;  %s1866_s28 = smov 0  }
   0x2   :  { %s1868_s29 = smov 0   ;;  %s1870_s30 = smov 0  }
   0x3 LB: > { %s1885_s9 = sadd.s32 4294967295, %s1809_s30   ;;  %s1638_s10 = sadd.s32 4294967294, %s1809_s30   ;;  %s1809_s30 = sphi %s1870_s30, %s2740_s30   ;;  %s1805_s29 = sphi %s1868_s29, %s2739_s29   ;;  %s1801_s28 = sphi %s1866_s28, %s2738_s28   ;;  %s1797_s27 = sphi %s1864_s27, %s2737_s27  }
   0x4   : > { %s1889_s11 = sadd.s32 1, %s1809_s30   ;;  %s201_s12 = sadd.s32 1, %s1805_s29 }
   0x5   : > { %s198_s13 = ssub.s32 %s1809_s30, %s1889_s11  ;;  %p211_p0 = scmp.ne.s32.totalorder %s1805_s29, %s1801_s28 }
   0x6   : > { %p199_p1 = scmp.eq.s32.totalorder %s198_s13, 0  ;;  %p212_p2 = scmp.eq.s32.totalorder %s1885_s9, 1 }
   0x7   : > { %p217_p3 = scmp.ne.s32.totalorder %s1801_s28, %s1797_s27  ;;  %p218_p4 = scmp.eq.s32.totalorder %s1638_s10, 1 }
   0x8   : > { %s1900_s14 = scalar_select %p199_p1, %s1805_s29, %s201_s12  }
   0x9   : > { %p1902_p5 = por %p212_p2, %p211_p0  ;;  %p1906_p6 = por %p218_p4, %p217_p3 }
   0xa   : > { %p1641_p7 = scmp.ge.s32.totalorder %s1809_s30, 1  ;;  %p265_p8 = scmp.lt.s32.totalorder %s1809_s30, 3 }
   0xc   : > { %p266_p9 = pnand %p1641_p7, %p265_p8 }
   0xe   : > { %269 = sbr.rel (%p266_p9) target bundleno = 835 (0x343), region = 52 }
  0x15   : > { %v312_v0 = vld [vmem:[%s2717_s3 + $0x10] sm:$0xff]  ;;  %v310_v1 = vld [vmem:[%s2717_s3] sm:$0xff]  ;;  %p299_p10 = scmp.lt.s32.totalorder %s1885_s9, 1  ;;  %v2723_v2 = vmov 0   ;;  %v313_v3 = vld [vmem:[%s2717_s3 + $0x18] sm:$0xff]  ;;  %v1812_v5 = vmov 0.0  }
  0x16   : > { %1744 = vset.pattern.permute.xlu1 %v2723_v2  ;;  %1743 = vset.pattern.permute.xlu0 %v2723_v2  ;;  %v311_v4 = vld [vmem:[%s2717_s3 + $0x8] sm:$0xff]  ;;  %v306_v8 = vld [vmem:[%s2716_s2] sm:$0xff]  ;;  %vm334_vm0 = vcmask 64512   ;;  %v308_v14 = vld [vmem:[%s2716_s2 + $0x10] sm:$0xff]  ;;  %s1814_s22 = smov 96   ;;  %vm710_vm1 = vcmask 785408  }
  0x17   : > { %326 = vperm.xlu1 %1744, %v312_v0   ;;  %316 = vperm.xlu0 %1743, %v310_v1   ;;  %s300_s21 = scalar_select %p299_p10, %s1885_s9, 1  ;;  %v1650_v9 = vld [vmem:[%s2718_s4 + $0x68] sm:$0xff]  ;;  %v1649_v10 = vld [vmem:[%s2718_s4 + $0x60] sm:$0xff]  ;;  %v309_v17 = vld [vmem:[%s2716_s2 + $0x18] sm:$0xff]  ;;  %vm592_vm2 = vcmask 916480   ;;  %vm790_vm5 = vcmask 138240  }
  0x18   : > { %411 = vmatprep.mubr.f32.mxu0 %v1812_v5  ;;  %1553 = vmatprep.mubr.f32.mxu1 %v1812_v5  ;;  %v307_v11 = vld [vmem:[%s2716_s2 + $0x8] sm:$0xff]  ;;  %v1661_v13 = vld [vmem:[%s2718_s4 + $0x80] sm:$0xff]  ;;  %v1652_v22 = vld [vmem:[%s2718_s4 + $0x78] sm:$0xff]  ;;  %s1815_s23 = smov 17   ;;  %s1816_s24 = smov 16   ;;  %vm1397_vm6 = vcmask 121856  }
  0x19   : > { %s1687_s26 = sshll.u32 %s300_s21, 4  ;;  %v1662_v12 = vld [vmem:[%s2718_s4 + $0x88] sm:$0xff]  ;;  %v1653_v16 = vld [vmem:[%s2718_s4 + $0xc0] sm:$0xff]  ;;  %v1651_v23 = vld [vmem:[%s2718_s4 + $0x70] sm:$0xff]  ;;  %s1813_s21 = smov 112   ;;  %vm1078_vm7 = vcmask 130048  }
  0x1a   : > { %s1931_s13 = scalar_lea.vmem %s2714_s0, %s1687_s26  ;;  %v1654_v15 = vld [vmem:[%s2718_s4 + $0xc8] sm:$0xff]  ;;  %v1673_v19 = vld [vmem:[%s2718_s4 + $0xa0] sm:$0xff]  ;;  %v1664_v26 = vld [vmem:[%s2718_s4 + $0x98] sm:$0xff]  ;;  %s1817_s25 = smov 15   ;;  %vm1485_vm12 = vcmask 261120  }
  0x1b   : > { %331 = vperm.xlu1 %1744, %v313_v3   ;;  %321 = vperm.xlu0 %1743, %v311_v4   ;;  %v305_v6 = vld [vmem:[%s1931_s13 + $0x8] sm:$0xff]  ;;  %v304_v7 = vld [vmem:[%s1931_s13] sm:$0xff]  ;;  %v1663_v27 = vld [vmem:[%s2718_s4 + $0x90] sm:$0xff]  ;;  %s296_s20 = sand.u32 1, %s1801_s28  }
  0x1c   : > { %347 = vmatprep.subr.mxu0 %v305_v6  ;;  %v1674_v18 = vld [vmem:[%s2718_s4 + $0xa8] sm:$0xff]  ;;  %v1665_v21 = vld [vmem:[%s2718_s4 + $0xe0] sm:$0xff]  ;;  %v1656_v28 = vld [vmem:[%s2718_s4 + $0xd8] sm:$0xff] }
  0x1d   : > { %348 = vmatpush1.msra.mxu0 %v304_v7  ;;  %v1666_v20 = vld [vmem:[%s2718_s4 + $0xe8] sm:$0xff]  ;;  %v1677_v25 = vld [vmem:[%s2718_s4 + $0x100] sm:$0xff]  ;;  %v1655_v29 = vld [vmem:[%s2718_s4 + $0xd0] sm:$0xff] }
  0x1e   : > { %1645 = vmatmul.mubr.msk.f32.vlgmr.msra.gmra.mrb[0].mxu0 %vm334_vm0, %v306_v8  ;;  %v1678_v24 = vld [vmem:[%s2718_s4 + $0x108] sm:$0xff]  ;;  %v1676_v30 = vld [vmem:[%s2718_s4 + $0xb8] sm:$0xff]  ;;  %v1675_v31 = vld [vmem:[%s2718_s4 + $0xb0] sm:$0xff] }
  0x1f   : > { %531 = vperm.xlu1 %1744, %v1650_v9   ;;  %526 = vperm.xlu0 %1743, %v1649_v10   ;;  %v1668_v32 = vld [vmem:[%s2718_s4 + $0xf8] sm:$0xff]  ;;  %v1667_v33 = vld [vmem:[%s2718_s4 + $0xf0] sm:$0xff]  ;;  %v484_v36 = vld [vmem:[%s2718_s4 + $0x8] sm:$0xff] }
  0x20   : > { %417 = vmatprep.mubr.f32.mxu0 %v1812_v5  ;;  %v1680_v34 = vld [vmem:[%s2718_s4 + $0x118] sm:$0xff]  ;;  %v1679_v35 = vld [vmem:[%s2718_s4 + $0x110] sm:$0xff]  ;;  %v483_v37 = vld [vmem:[%s2718_s4] sm:$0xff] }
  0x21   : > { %v1658_v38 = vld [vmem:[%s2718_s4 + $0x28] sm:$0xff]  ;;  %v1657_v39 = vld [vmem:[%s2718_s4 + $0x20] sm:$0xff]  ;;  %v486_v42 = vld [vmem:[%s2718_s4 + $0x18] sm:$0xff] }
  0x22   : > { %1646 = vmatmul.mubr.msk.f32.gmra.mrb[2].mxu0 %vm334_vm0, %v307_v11  ;;  %v1670_v40 = vld [vmem:[%s2718_s4 + $0x48] sm:$0xff]  ;;  %v1669_v41 = vld [vmem:[%s2718_s4 + $0x40] sm:$0xff]  ;;  %v485_v43 = vld [vmem:[%s2718_s4 + $0x10] sm:$0xff] }
  0x23   : > { %864 = vperm.xlu1 %1744, %v1662_v12   ;;  %859 = vperm.xlu0 %1743, %v1661_v13   ;;  %v1660_v44 = vld [vmem:[%s2718_s4 + $0x38] sm:$0xff]  ;;  %v1659_v45 = vld [vmem:[%s2718_s4 + $0x30] sm:$0xff]  ;;  %v1431_v48 = vld [vmem:[%s2719_s5 + $0x8] sm:$0xff] }
  0x24   : > { %423 = vmatprep.mubr.f32.mxu0 %v1812_v5  ;;  %v1672_v46 = vld [vmem:[%s2718_s4 + $0x58] sm:$0xff]  ;;  %v1671_v47 = vld [vmem:[%s2718_s4 + $0x50] sm:$0xff]  ;;  %v1430_v49 = vld [vmem:[%s2719_s5] sm:$0xff] }
  0x25   : > { %v1433_v50 = vld [vmem:[%s2719_s5 + $0x18] sm:$0xff]  ;;  %v1432_v51 = vld [vmem:[%s2719_s5 + $0x10] sm:$0xff] }
  0x26   : > { %1647 = vmatmul.mubr.msk.f32.gmra.mrb[4].mxu0 %vm334_vm0, %v308_v14 }
  0x27   : > { %649 = vperm.xlu1 %1744, %v1654_v15   ;;  %644 = vperm.xlu0 %1743, %v1653_v16  }
  0x28   : > { %429 = vmatprep.mubr.f32.mxu0 %v1812_v5 }
  0x2a   : > { %1648 = vmatmul.mubr.msk.f32.gmra.mrb[6].mxu0 %vm334_vm0, %v309_v17 }
  0x2b   : > { %1152 = vperm.xlu1 %1744, %v1674_v18   ;;  %1147 = vperm.xlu0 %1743, %v1673_v19  }
  0x2f   : > { %949 = vperm.xlu1 %1744, %v1666_v20   ;;  %944 = vperm.xlu0 %1743, %v1665_v21  }
  0x33   : > { %541 = vperm.xlu1 %1744, %v1652_v22   ;;  %536 = vperm.xlu0 %1743, %v1651_v23  }
  0x37   : > { %1257 = vperm.xlu1 %1744, %v1678_v24   ;;  %1252 = vperm.xlu0 %1743, %v1677_v25  }
  0x3b   : > { %874 = vperm.xlu1 %1744, %v1664_v26   ;;  %869 = vperm.xlu0 %1743, %v1663_v27  }
  0x3f   : > { %659 = vperm.xlu1 %1744, %v1656_v28   ;;  %654 = vperm.xlu0 %1743, %v1655_v29  }
  0x43   : > { %1162 = vperm.xlu1 %1744, %v1676_v30   ;;  %1157 = vperm.xlu0 %1743, %v1675_v31  }
  0x47   : > { %959 = vperm.xlu1 %1744, %v1668_v32   ;;  %954 = vperm.xlu0 %1743, %v1667_v33  }
  0x4b   : > { %1267 = vperm.xlu1 %1744, %v1680_v34   ;;  %1262 = vperm.xlu0 %1743, %v1679_v35  }
  0x4f   : > { %494 = vperm.xlu1 %1744, %v484_v36   ;;  %489 = vperm.xlu0 %1743, %v483_v37  }
  0x53   : > { %827 = vperm.xlu1 %1744, %v1658_v38   ;;  %822 = vperm.xlu0 %1743, %v1657_v39  }
  0x57   : > { %1115 = vperm.xlu1 %1744, %v1670_v40   ;;  %1110 = vperm.xlu0 %1743, %v1669_v41  }
  0x5b   : > { %504 = vperm.xlu1 %1744, %v486_v42   ;;  %499 = vperm.xlu0 %1743, %v485_v43  }
  0x5f   : > { %837 = vperm.xlu1 %1744, %v1660_v44   ;;  %832 = vperm.xlu0 %1743, %v1659_v45  }
  0x63   : > { %1125 = vperm.xlu1 %1744, %v1672_v46   ;;  %1120 = vperm.xlu0 %1743, %v1671_v47  }
  0x67   : > { %1441 = vperm.xlu1 %1744, %v1431_v48   ;;  %1436 = vperm.xlu0 %1743, %v1430_v49  }
  0x6b   : > { %1451 = vperm.xlu1 %1744, %v1433_v50   ;;  %1446 = vperm.xlu0 %1743, %v1432_v51  }
  0x96   : > { %v2071_v52 = vpop.permute.xlu1 %326  ;;  %v2073_v53 = vpop.permute.xlu0 %316 }
  0x9a   : > { %v2075_v54 = vpop.permute.xlu1 %331  ;;  %v2077_v55 = vpop.permute.xlu0 %321 }
  0x9e   : > { %v2079_v56 = vpop.permute.xlu1 %531  ;;  %v2081_v57 = vpop.permute.xlu0 %526 }
  0x9f   : > { %v547_v58 = vmul.f32 0.0, %v2079_v56  ;;  %v544_v59 = vmul.f32 0.0, %v2081_v57 }
  0xa1   : > { %574 = vrot.lane.b32.xlu1 %v547_v58, %s1813_s21  ;;  %568 = vrot.lane.b32.xlu0 %v544_v59, %s1813_s21 }
  0xa2   : > { %v2087_v60 = vpop.permute.xlu1 %864  ;;  %v2089_v61 = vpop.permute.xlu0 %859 }
  0xa6   : > { %v2091_v62 = vpop.permute.xlu1 %649  ;;  %v2093_v63 = vpop.permute.xlu0 %644 }
  0xa7   : > { %v667_v0 = vmul.f32 0.0, %v2091_v62  ;;  %v664_v1 = vmul.f32 0.0, %v2093_v63 }
  0xa9   : > { %696 = vrot.lane.b32.xlu1 %v667_v0, %s1814_s22  ;;  %690 = vrot.lane.b32.xlu0 %v664_v1, %s1814_s22 }
  0xaa   : > { %v2099_v3 = vpop.permute.xlu1 %1152  ;;  %v2101_v4 = vpop.permute.xlu0 %1147 }
  0xab   : > { %v1170_v5 = vmul.f32 0.0, %v2099_v3  ;;  %v1167_v6 = vmul.f32 0.0, %v2101_v4 }
  0xad   : > { %1199 = vrot.lane.b32.xlu1 %v1170_v5, %s1813_s21  ;;  %1193 = vrot.lane.b32.xlu0 %v1167_v6, %s1813_s21 }
  0xae   : > { %v2107_v7 = vpop.permute.xlu1 %949  ;;  %v2109_v8 = vpop.permute.xlu0 %944 }
  0xaf   : > { %v967_v9 = vmul.f32 0.0, %v2107_v7  ;;  %v964_v10 = vmul.f32 0.0, %v2109_v8 }
  0xb1   : > { %996 = vrot.lane.b32.xlu1 %v967_v9, %s1814_s22  ;;  %990 = vrot.lane.b32.xlu0 %v964_v10, %s1814_s22 }
  0xb2   : > { %v2115_v11 = vpop.permute.xlu1 %541  ;;  %v2117_v12 = vpop.permute.xlu0 %536 }
  0xb3   : > { %v553_v17 = vmul.f32 0.0, %v2115_v11  ;;  %v550_v18 = vmul.f32 0.0, %v2117_v12 }
  0xb6   : > { %v2119_v13 = vpop.permute.xlu1 %1257  ;;  %v2121_v14 = vpop.permute.xlu0 %1252 }
  0xb7   : > { %v1275_v15 = vmul.f32 0.0, %v2119_v13  ;;  %v1272_v16 = vmul.f32 0.0, %v2121_v14 }
  0xb9   : > { %1304 = vrot.lane.b32.xlu1 %v1275_v15, %s1814_s22  ;;  %1298 = vrot.lane.b32.xlu0 %v1272_v16, %s1814_s22 }
  0xba   : > { %v2129_v19 = vpop.permute.xlu1 %874  ;;  %v2131_v20 = vpop.permute.xlu0 %869 }
  0xbd   : > { %586 = vrot.lane.b32.xlu1 %v553_v17, %s1813_s21  ;;  %580 = vrot.lane.b32.xlu0 %v550_v18, %s1813_s21 }
  0xbe   : > { %v2135_v21 = vpop.permute.xlu1 %659  ;;  %v2137_v22 = vpop.permute.xlu0 %654 }
  0xbf   : > { %v673_v23 = vmul.f32 0.0, %v2135_v21  ;;  %v670_v24 = vmul.f32 0.0, %v2137_v22 }
  0xc1   : > { %708 = vrot.lane.b32.xlu1 %v673_v23, %s1814_s22  ;;  %702 = vrot.lane.b32.xlu0 %v670_v24, %s1814_s22 }
  0xc2   : > { %v2143_v25 = vpop.permute.xlu1 %1162  ;;  %v2145_v26 = vpop.permute.xlu0 %1157 }
  0xc3   : > { %v1176_v27 = vmul.f32 0.0, %v2143_v25  ;;  %v1173_v28 = vmul.f32 0.0, %v2145_v26 }
  0xc5   : > { %1211 = vrot.lane.b32.xlu1 %v1176_v27, %s1813_s21  ;;  %1205 = vrot.lane.b32.xlu0 %v1173_v28, %s1813_s21 }
  0xc6   : > { %v2151_v29 = vpop.permute.xlu1 %959  ;;  %v2153_v30 = vpop.permute.xlu0 %954 }
  0xc7   : > { %v973_v31 = vmul.f32 0.0, %v2151_v29  ;;  %v970_v32 = vmul.f32 0.0, %v2153_v30 }
  0xc9   : > { %1008 = vrot.lane.b32.xlu1 %v973_v31, %s1814_s22  ;;  %1002 = vrot.lane.b32.xlu0 %v970_v32, %s1814_s22 }
  0xca   : > { %v2159_v33 = vpop.permute.xlu1 %1267  ;;  %v2161_v34 = vpop.permute.xlu0 %1262 }
  0xcb   : > { %v1281_v35 = vmul.f32 0.0, %v2159_v33  ;;  %v1278_v36 = vmul.f32 0.0, %v2161_v34 }
  0xcd   : > { %1316 = vrot.lane.b32.xlu1 %v1281_v35, %s1814_s22  ;;  %1310 = vrot.lane.b32.xlu0 %v1278_v36, %s1814_s22 }
  0xce   : > { %v2195_v1 = vpop.permute.xlu0 %489  ;;  %v2200_v6 = vpop.permute.xlu1 %494 }
  0xd2   : > { %v2210_v16 = vpop.permute.xlu0 %822  ;;  %v2213_v17 = vpop.permute.xlu1 %827 }
  0xd6   : > { %v2229_v31 = vpop.permute.xlu1 %1115 }
  0xf1   : > { %v413_v37 = vpop.f32.mrb[0].mxu0 }
  0xf2   : > { %v414_v38 = vadd.f32 %v413_v37, %v2073_v53  ;;  %v415_v39 = vpop.f32.mrb[1].mxu0  ;;  %v2244_v37 = vpop.permute.xlu1 %504 }
  0xf3   : > { %v416_v40 = vadd.f32 %v415_v39, %v2073_v53 }
  0xf4   : > { %v436_v41 = vmax.f32 %v414_v38, 0.0 }
  0xf5   : > { %v437_v42 = vmax.f32 %v416_v40, 0.0  ;;  %v419_v43 = vpop.f32.mrb[2].mxu0 }
  0xf6   : > { %v2169_v44 = vmin.f32 %v436_v41, 6.0  ;;  %v421_v45 = vpop.f32.mrb[3].mxu0 }
  0xf7   : > { %v2171_v46 = vmin.f32 %v437_v42, 6.0  ;;  %v422_v18 = vadd.f32 %v421_v45, %v2077_v55 }
  0xf8   : > { %v545_v47 = vmul.f32 %v2081_v57, %v2169_v44  ;;  %v877_v51 = vmul.f32 %v2089_v61, %v2169_v44  ;;  %v1165_v5 = vmul.f32 %v2101_v4, %v2169_v44  ;;  %v962_v10 = vmul.f32 %v2109_v8, %v2169_v44 }
  0xf9   : > { %v425_v48 = vpop.f32.mrb[4].mxu0  ;;  %v546_v49 = vmul.f32 %v2081_v57, %v2171_v46  ;;  %v878_v58 = vmul.f32 %v2089_v61, %v2171_v46  ;;  %v662_v57 = vmul.f32 %v2093_v63, %v2169_v44  ;;  %v663_v0 = vmul.f32 %v2093_v63, %v2171_v46 }
  0xfa   : > { %v427_v50 = vpop.f32.mrb[5].mxu0  ;;  %570 = vrot.lane.b32.xlu0 %v545_v47, %s1813_s21  ;;  %v420_v61 = vadd.f32 %v419_v43, %v2077_v55  ;;  %v1166_v9 = vmul.f32 %v2101_v4, %v2171_v46  ;;  %v963_v15 = vmul.f32 %v2109_v8, %v2171_v46  ;;  %v1270_v23 = vmul.f32 %v2121_v14, %v2169_v44  ;;  %v2225_v8 = vpop.permute.xlu0 %1110 }
  0xfb   : > { %572 = vrot.lane.b32.xlu1 %v546_v49, %s1813_s21  ;;  %v1271_v24 = vmul.f32 %v2121_v14, %v2171_v46  ;;  %v439_v27 = vmax.f32 %v422_v18, 0.0  ;;  %v426_v41 = vadd.f32 %v425_v48, %v2071_v52  ;;  %v2258_v43 = vpop.permute.xlu1 %837  ;;  %v428_v45 = vadd.f32 %v427_v50, %v2071_v52 }
  0xfc   : > { %v438_v63 = vmax.f32 %v420_v61, 0.0 }
  0xfd   : > { %v2181_v53 = vpop.f32.mrb[6].mxu0  ;;  %v2235_v14 = vmin.f32 %v439_v27, 6.0  ;;  %v440_v47 = vmax.f32 %v426_v41, 0.0 }
  0xfe   : > { %v2185_v59 = vpop.f32.mrb[7].mxu0  ;;  %893 = vrot.lane.b32.xlu0 %v877_v51, %s1813_s21  ;;  %v2216_v4 = vmin.f32 %v438_v63, 6.0  ;;  %v2241_v36 = vpop.permute.xlu0 %499  ;;  %v441_v51 = vmax.f32 %v428_v45, 0.0 }
  0xff   : > { %895 = vrot.lane.b32.xlu1 %v878_v58, %s1813_s21  ;;  %v666_v38 = vmul.f32 %v2091_v62, %v2235_v14  ;;  %v1169_v42 = vmul.f32 %v2099_v3, %v2235_v14  ;;  %v966_v49 = vmul.f32 %v2107_v7, %v2235_v14  ;;  %v549_v48 = vmul.f32 %v2079_v56, %v2235_v14  ;;  %v2272_v52 = vpop.permute.xlu1 %1125 }
 0x100   : > { %v548_v28 = vmul.f32 %v2079_v56, %v2216_v4  ;;  %v665_v55 = vmul.f32 %v2091_v62, %v2216_v4  ;;  %v879_v32 = vmul.f32 %v2087_v60, %v2216_v4  ;;  %v1168_v35 = vmul.f32 %v2099_v3, %v2216_v4 }
 0x101   : > { %v965_v39 = vmul.f32 %v2107_v7, %v2216_v4  ;;  %v1273_v62 = vmul.f32 %v2119_v13, %v2216_v4  ;;  %v2275_v50 = vmin.f32 %v440_v47, 6.0  ;;  %v1274_v58 = vmul.f32 %v2119_v13, %v2235_v14 }
 0x102   : > { %686 = vrot.lane.b32.xlu0 %v662_v57, %s1814_s22  ;;  %v2253_v40 = vpop.permute.xlu0 %832  ;;  %v2279_v57 = vmin.f32 %v441_v51, 6.0  ;;  %v880_v7 = vmul.f32 %v2087_v60, %v2235_v14 }
 0x103   : > { %688 = vrot.lane.b32.xlu1 %v663_v0, %s1814_s22  ;;  %v551_v0 = vmul.f32 %v2117_v12, %v2275_v50  ;;  %v2289_v61 = vpop.permute.xlu1 %1441  ;;  %v881_v60 = vmul.f32 %v2131_v20, %v2275_v50 }
 0x104   : > { %2730 = vst [vmem:[#allocation6_spill] sm:$0xff] %v2289_v61  ;;  %v882_v13 = vmul.f32 %v2131_v20, %v2279_v57  ;;  %v432_v20 = vadd.f32 %v2181_v53, %v2075_v54  ;;  %v969_v53 = vmul.f32 %v2153_v30, %v2279_v57 }
 0x106   : > { %1189 = vrot.lane.b32.xlu0 %v1165_v5, %s1813_s21  ;;  %v2269_v3 = vpop.permute.xlu0 %1120  ;;  %v552_v5 = vmul.f32 %v2117_v12, %v2279_v57  ;;  %v668_v12 = vmul.f32 %v2137_v22, %v2275_v50 }
 0x107   : > { %1191 = vrot.lane.b32.xlu1 %v1166_v9, %s1813_s21  ;;  %v2302_v63 = vpop.permute.xlu1 %1451 }
 0x108   : > { %2732 = vst [vmem:[#allocation8_spill] sm:$0xff] %v2302_v63 }
 0x10a   : > { %986 = vrot.lane.b32.xlu0 %v962_v10, %s1814_s22  ;;  %v2285_v56 = vpop.permute.xlu0 %1436  ;;  %v669_v10 = vmul.f32 %v2137_v22, %v2279_v57  ;;  %v442_v22 = vmax.f32 %v432_v20, 0.0 }
 0x10b   : > { %988 = vrot.lane.b32.xlu1 %v963_v15, %s1814_s22 }
 0x10e   : > { %1294 = vrot.lane.b32.xlu0 %v1270_v23, %s1814_s22  ;;  %v2299_v9 = vpop.permute.xlu0 %1446  ;;  %v1171_v23 = vmul.f32 %v2145_v26, %v2275_v50 }
 0x10f   : > { %1296 = vrot.lane.b32.xlu1 %v1271_v24, %s1814_s22  ;;  %2731 = vst [vmem:[#allocation7_spill] sm:$0xff] %v2299_v9  ;;  %v1172_v24 = vmul.f32 %v2145_v26, %v2279_v57  ;;  %v2333_v26 = vmin.f32 %v442_v22, 6.0 }
 0x111   : > { %v883_v45 = vmul.f32 %v2129_v19, %v2333_v26  ;;  %v1174_v47 = vmul.f32 %v2143_v25, %v2333_v26  ;;  %v971_v51 = vmul.f32 %v2151_v29, %v2333_v26 }
 0x112   : > { %576 = vrot.lane.b32.xlu0 %v548_v28, %s1813_s21  ;;  %v968_v28 = vmul.f32 %v2153_v30, %v2275_v50 }
 0x113   : > { %692 = vrot.lane.b32.xlu1 %v665_v55, %s1814_s22  ;;  %v2309_v15 = vpop.permute.xlu0 %568  ;;  %v2312_v18 = vpop.permute.xlu1 %574 }
 0x116   : > { %897 = vrot.lane.b32.xlu0 %v879_v32, %s1813_s21  ;;  %v434_v32 = vadd.f32 %v2185_v59, %v2075_v54  ;;  %v671_v54 = vmul.f32 %v2135_v21, %v2333_v26 }
 0x117   : > { %1195 = vrot.lane.b32.xlu1 %v1168_v35, %s1813_s21  ;;  %v1276_v35 = vmul.f32 %v2161_v34, %v2275_v50 }
 0x118   : > { %v443_v41 = vmax.f32 %v434_v32, 0.0 }
 0x11a   : > { %694 = vrot.lane.b32.xlu0 %v666_v38, %s1814_s22  ;;  %v1277_v38 = vmul.f32 %v2161_v34, %v2279_v57  ;;  %v2353_v34 = vmin.f32 %v443_v41, 6.0 }
 0x11b   : > { %992 = vrot.lane.b32.xlu1 %v965_v39, %s1814_s22  ;;  %v2323_v27 = vpop.permute.xlu0 %690  ;;  %v2327_v55 = vpop.permute.xlu1 %696 }
 0x11e   : > { %1197 = vrot.lane.b32.xlu0 %v1169_v42, %s1813_s21  ;;  %v554_v42 = vmul.f32 %v2115_v11, %v2333_v26 }
 0x11f   : > { %1300 = vrot.lane.b32.xlu1 %v1273_v62, %s1814_s22  ;;  %v2341_v39 = vpop.permute.xlu0 %1193  ;;  %v2344_v30 = vpop.permute.xlu1 %1199 }
 0x122   : > { %994 = vrot.lane.b32.xlu0 %v966_v49, %s1814_s22  ;;  %v672_v49 = vmul.f32 %v2135_v21, %v2353_v34 }
 0x123   : > { %578 = vrot.lane.b32.xlu1 %v549_v48, %s1813_s21  ;;  %v991_v59 = vpop.permute.xlu0 %990  ;;  %v2357_v62 = vpop.permute.xlu1 %996 }
 0x126   : > { %1302 = vrot.lane.b32.xlu0 %v1274_v58, %s1814_s22 }
 0x127   : > { %899 = vrot.lane.b32.xlu1 %v880_v7, %s1813_s21  ;;  %v1175_v7 = vmul.f32 %v2143_v25, %v2353_v34  ;;  %v1280_v25 = vmul.f32 %v2159_v33, %v2353_v34 }
 0x12a   : > { %582 = vrot.lane.b32.xlu0 %v551_v0, %s1813_s21  ;;  %v1279_v0 = vmul.f32 %v2159_v33, %v2333_v26 }
 0x12b   : > { %584 = vrot.lane.b32.xlu1 %v552_v5, %s1813_s21  ;;  %v2367_v48 = vpop.permute.xlu0 %1298  ;;  %v2370_v58 = vpop.permute.xlu1 %1304  ;;  %v972_v5 = vmul.f32 %v2151_v29, %v2353_v34 }
 0x12e   : > { %901 = vrot.lane.b32.xlu0 %v881_v60, %s1813_s21 }
 0x12f   : > { %903 = vrot.lane.b32.xlu1 %v882_v13, %s1813_s21  ;;  %v2379_v21 = vpop.permute.xlu0 %580  ;;  %v2383_v60 = vpop.permute.xlu1 %586  ;;  %v555_v13 = vmul.f32 %v2115_v11, %v2353_v34 }
 0x132   : > { %698 = vrot.lane.b32.xlu0 %v668_v12, %s1814_s22  ;;  %v884_v12 = vmul.f32 %v2129_v19, %v2353_v34 }
 0x133   : > { %700 = vrot.lane.b32.xlu1 %v669_v10, %s1814_s22  ;;  %v2393_v10 = vpop.permute.xlu0 %702  ;;  %v2396_v29 = vpop.permute.xlu1 %708 }
 0x136   : > { %1201 = vrot.lane.b32.xlu0 %v1171_v23, %s1813_s21 }
 0x137   : > { %1203 = vrot.lane.b32.xlu1 %v1172_v24, %s1813_s21  ;;  %v2399_v20 = vpop.permute.xlu0 %1205  ;;  %v2401_v11 = vpop.permute.xlu1 %1211 }
 0x13a   : > { %998 = vrot.lane.b32.xlu0 %v968_v28, %s1814_s22 }
 0x13b   : > { %1000 = vrot.lane.b32.xlu1 %v969_v53, %s1814_s22  ;;  %v2403_v23 = vpop.permute.xlu0 %1002  ;;  %v2405_v24 = vpop.permute.xlu1 %1008 }
 0x13e   : > { %1306 = vrot.lane.b32.xlu0 %v1276_v35, %s1814_s22  ;;  %v509_v35 = vmul.f32 %v2195_v1, %v2171_v46 }
 0x13f   : > { %1308 = vrot.lane.b32.xlu1 %v1277_v38, %s1814_s22  ;;  %v2407_v33 = vpop.permute.xlu0 %1310  ;;  %v2409_v22 = vpop.permute.xlu1 %1316 }
 0x142   : > { %588 = vrot.lane.b32.xlu0 %v554_v42, %s1813_s21 }
 0x143   : > { %704 = vrot.lane.b32.xlu1 %v671_v54, %s1814_s22 }
 0x146   : > { %905 = vrot.lane.b32.xlu0 %v883_v45, %s1813_s21 }
 0x147   : > { %1207 = vrot.lane.b32.xlu1 %v1174_v47, %s1813_s21 }
 0x14a   : > { %706 = vrot.lane.b32.xlu0 %v672_v49, %s1814_s22  ;;  %v840_v49 = vmul.f32 0.0, %v2210_v16 }
 0x14b   : > { %1004 = vrot.lane.b32.xlu1 %v971_v51, %s1814_s22 }
 0x14e   : > { %1209 = vrot.lane.b32.xlu0 %v1175_v7, %s1813_s21 }
 0x14f   : > { %1312 = vrot.lane.b32.xlu1 %v1279_v0, %s1814_s22  ;;  %v842_v0 = vmul.f32 %v2210_v16, %v2171_v46 }
 0x152   : > { %1006 = vrot.lane.b32.xlu0 %v972_v5, %s1814_s22 }
 0x153   : > { %590 = vrot.lane.b32.xlu1 %v555_v13, %s1813_s21 }
 0x156   : > { %1314 = vrot.lane.b32.xlu0 %v1280_v25, %s1814_s22  ;;  %v1128_v25 = vmul.f32 0.0, %v2225_v8  ;;  %s1688_s22 = sshll.u32 %s1885_s9, 8  ;;  %s1565_s9 = scalar_lea.sflag [#allocation4], %s296_s20 }
 0x157   : > { %907 = vrot.lane.b32.xlu1 %v884_v12, %s1813_s21  ;;  %s1642_s21 = sshll.u32 %s296_s20, 4  ;;  %s2672_s10 = scalar_lea.hbm %s2722_s8, %s1688_s22 }
 0x16c   : > { %v571_v19 = vpop.permute.xlu0 %570 }
 0x16d   : > { %v573_v28 = vpop.permute.xlu1 %572 }
 0x16e   : > { %v615_v41 = vadd.f32 %v573_v28, %v509_v35 }
 0x170   : > { %v894_v53 = vpop.permute.xlu0 %893 }
 0x171   : > { %v896_v32 = vpop.permute.xlu1 %895  ;;  %v925_v7 = vadd.f32 %v894_v53, %v840_v49 }
 0x172   : > { %v927_v13 = vadd.f32 %v896_v32, %v842_v0  ;;  %v593_v0 = vsel %vm592_vm2, %v2309_v15, %v571_v19  ;;  %v508_v15 = vmul.f32 %v2195_v1, %v2169_v44 }
 0x174   : > { %v687_v38 = vpop.permute.xlu0 %686 }
 0x175   : > { %v689_v42 = vpop.permute.xlu1 %688 }
 0x176   : > { %v712_v54 = vsel %vm710_vm1, %v689_v42, %v2323_v27 }
 0x177   : > { %v733_v45 = vadd.f32 %v712_v54, %v615_v41 }
 0x178   : > { %v1190_v47 = vpop.permute.xlu0 %1189 }
 0x179   : > { %v1192_v51 = vpop.permute.xlu1 %1191  ;;  %770 = vrot.lane.b32.xlu1 %v733_v45, %s1815_s23  ;;  %v1233_v54 = vadd.f32 %v1190_v47, %v1128_v25  ;;  %v1130_v45 = vmul.f32 %v2225_v8, %v2171_v46 }
 0x17a   : > { %v1214_v27 = vsel %vm592_vm2, %v1192_v51, %v2341_v39 }
 0x17b   : > { %v1235_v63 = vadd.f32 %v1214_v27, %v1130_v45 }
 0x17c   : > { %v987_v5 = vpop.permute.xlu0 %986 }
 0x17d   : > { %v1030_v12 = vadd.f32 %v987_v5, %v925_v7  ;;  %v989_v35 = vpop.permute.xlu1 %988  ;;  %v507_v7 = vmul.f32 0.0, %v2195_v1  ;;  %v843_v1 = vmul.f32 0.0, %v2213_v17 }
 0x17e   : > { %v1011_v41 = vsel %vm710_vm1, %v989_v35, %v991_v59  ;;  %v1010_v45 = vsel %vm710_vm1, %v987_v5, %v989_v35 }
 0x17f   : > { %v1032_v49 = vadd.f32 %v1011_v41, %v927_v13  ;;  %1054 = vrot.lane.b32.xlu0 %v1030_v12, %s1816_s24  ;;  %v613_v59 = vadd.f32 %v593_v0, %v507_v7  ;;  %v594_v13 = vsel %vm592_vm2, %v571_v19, %v573_v28  ;;  %v711_v41 = vsel %vm710_vm1, %v687_v38, %v689_v42 }
 0x180   : > { %v1295_v2 = vpop.permute.xlu0 %1294 }
 0x181   : > { %v1338_v9 = vadd.f32 %v1295_v2, %v1233_v54  ;;  %v1297_v61 = vpop.permute.xlu1 %1296  ;;  %1058 = vrot.lane.b32.xlu1 %v1032_v49, %s1816_s24  ;;  %v731_v12 = vadd.f32 %v687_v38, %v613_v59  ;;  %v614_v54 = vadd.f32 %v594_v13, %v508_v15  ;;  %v1213_v38 = vsel %vm592_vm2, %v1190_v47, %v1192_v51 }
 0x182   : > { %v1319_v39 = vsel %vm710_vm1, %v1297_v61, %v2367_v48 }
 0x183   : > { %v1340_v46 = vadd.f32 %v1319_v39, %v1235_v63  ;;  %1373 = vrot.lane.b32.xlu0 %v1338_v9, %s1817_s25  ;;  %v909_v63 = vsel %vm592_vm2, %v894_v53, %v896_v32  ;;  %v841_v9 = vmul.f32 %v2210_v16, %v2169_v44  ;;  %v732_v19 = vadd.f32 %v711_v41, %v614_v54 }
 0x184   : > { %v577_v25 = vpop.permute.xlu0 %576  ;;  %v1129_v53 = vmul.f32 %v2225_v8, %v2169_v44  ;;  %v1318_v16 = vsel %vm710_vm1, %v1295_v2, %v1297_v61  ;;  %v1131_v39 = vmul.f32 0.0, %v2229_v31  ;;  %v512_v2 = vmul.f32 %v2200_v6, %v2235_v14 }
 0x185   : > { %v693_v27 = vpop.permute.xlu1 %692  ;;  %1377 = vrot.lane.b32.xlu1 %v1340_v46, %s1817_s25  ;;  %v926_v49 = vadd.f32 %v909_v63, %v841_v9  ;;  %v595_v8 = vsel %vm592_vm2, %v2312_v18, %v577_v25  ;;  %v511_v61 = vmul.f32 %v2200_v6, %v2216_v4  ;;  %v844_v18 = vmul.f32 %v2213_v17, %v2216_v4 }
 0x186   : > { %v1234_v5 = vadd.f32 %v1213_v38, %v1129_v53 }
 0x187   : > { %766 = vrot.lane.b32.xlu0 %v731_v12, %s1815_s23  ;;  %v1031_v32 = vadd.f32 %v1010_v45, %v926_v49  ;;  %v510_v12 = vmul.f32 0.0, %v2200_v6  ;;  %v845_v6 = vmul.f32 %v2213_v17, %v2235_v14 }
 0x188   : > { %v898_v48 = vpop.permute.xlu0 %897  ;;  %v1339_v47 = vadd.f32 %v1318_v16, %v1234_v5 }
 0x189   : > { %v1196_v28 = vpop.permute.xlu1 %1195  ;;  %v928_v42 = vadd.f32 %v898_v48, %v843_v1 }
 0x18a   : > { %v1236_v35 = vadd.f32 %v1196_v28, %v1131_v39 }
 0x18b   : > { %768 = vrot.lane.b32.xlu0 %v732_v19, %s1815_s23  ;;  %v616_v19 = vadd.f32 %v595_v8, %v510_v12 }
 0x18c   : > { %v695_v0 = vpop.permute.xlu0 %694 }
 0x18d   : > { %v993_v7 = vpop.permute.xlu1 %992  ;;  %v714_v63 = vsel %vm710_vm1, %v695_v0, %v2327_v55  ;;  %v713_v45 = vsel %vm710_vm1, %v693_v27, %v695_v0  ;;  %v734_v55 = vadd.f32 %v693_v27, %v616_v19 }
 0x18e   : > { %v1033_v59 = vadd.f32 %v993_v7, %v928_v42 }
 0x18f   : > { %1056 = vrot.lane.b32.xlu0 %v1031_v32, %s1816_s24 }
 0x190   : > { %1060 = vrot.lane.b32.xlu1 %v1033_v59, %s1816_s24  ;;  %v1198_v46 = vpop.permute.xlu0 %1197  ;;  %v1132_v59 = vmul.f32 %v2229_v31, %v2216_v4 }
 0x191   : > { %v1301_v51 = vpop.permute.xlu1 %1300  ;;  %v1215_v0 = vsel %vm592_vm2, %v1196_v28, %v1198_v46  ;;  %v1133_v28 = vmul.f32 %v2229_v31, %v2235_v14 }
 0x192   : > { %v1341_v13 = vadd.f32 %v1301_v51, %v1236_v35 }
 0x193   : > { %1375 = vrot.lane.b32.xlu0 %v1339_v47, %s1817_s25  ;;  %v1237_v47 = vadd.f32 %v1215_v0, %v1132_v59 }
 0x194   : > { %1379 = vrot.lane.b32.xlu1 %v1341_v13, %s1817_s25  ;;  %v995_v44 = vpop.permute.xlu0 %994 }
 0x195   : > { %v579_v15 = vpop.permute.xlu1 %578  ;;  %v1012_v32 = vsel %vm710_vm1, %v993_v7, %v995_v44  ;;  %v1013_v27 = vsel %vm710_vm1, %v995_v44, %v2357_v62 }
 0x196   : > { %v596_v41 = vsel %vm592_vm2, %v577_v25, %v579_v15  ;;  %v618_v54 = vadd.f32 %v579_v15, %v512_v2  ;;  %v846_v15 = vmul.f32 0.0, %v2253_v40 }
 0x197   : > { %v617_v9 = vadd.f32 %v596_v41, %v511_v61 }
 0x198   : > { %v736_v1 = vadd.f32 %v714_v63, %v618_v54  ;;  %v1303_v49 = vpop.permute.xlu0 %1302  ;;  %v848_v54 = vmul.f32 %v2253_v40, %v2279_v57 }
 0x199   : > { %v735_v38 = vadd.f32 %v713_v45, %v617_v9  ;;  %v900_v42 = vpop.permute.xlu1 %899  ;;  %v1320_v17 = vsel %vm710_vm1, %v1301_v51, %v1303_v49  ;;  %v1321_v13 = vsel %vm710_vm1, %v1303_v49, %v2370_v58 }
 0x19a   : > { %v910_v25 = vsel %vm592_vm2, %v898_v48, %v900_v42  ;;  %776 = vrot.lane.b32.xlu1 %v736_v1, %s1815_s23  ;;  %v930_v16 = vadd.f32 %v900_v42, %v845_v6  ;;  %v1216_v48 = vsel %vm592_vm2, %v1198_v46, %v2344_v30  ;;  %v1342_v51 = vadd.f32 %v1320_v17, %v1237_v47 }
 0x19b   : > { %v929_v53 = vadd.f32 %v910_v25, %v844_v18  ;;  %774 = vrot.lane.b32.xlu0 %v735_v38, %s1815_s23  ;;  %v1238_v8 = vadd.f32 %v1216_v48, %v1133_v28  ;;  %v515_v30 = vmul.f32 %v2241_v36, %v2279_v57  ;;  %v1136_v42 = vmul.f32 %v2269_v3, %v2279_v57 }
 0x19c   : > { %v583_v39 = vpop.permute.xlu0 %582  ;;  %v1035_v7 = vadd.f32 %v1013_v27, %v930_v16  ;;  %v1135_v27 = vmul.f32 %v2269_v3, %v2275_v50 }
 0x19d   : > { %v1034_v5 = vadd.f32 %v1012_v32, %v929_v53  ;;  %v585_v35 = vpop.permute.xlu1 %584  ;;  %v1343_v62 = vadd.f32 %v1321_v13, %v1238_v8  ;;  %v597_v63 = vsel %vm592_vm2, %v2379_v21, %v583_v39  ;;  %v514_v53 = vmul.f32 %v2241_v36, %v2275_v50 }
 0x19e   : > { %772 = vrot.lane.b32.xlu1 %v734_v55, %s1815_s23  ;;  %v621_v44 = vadd.f32 %v585_v35, %v515_v30  ;;  %v598_v21 = vsel %vm592_vm2, %v583_v39, %v585_v35 }
 0x19f   : > { %1062 = vrot.lane.b32.xlu0 %v1034_v5, %s1816_s24  ;;  %v620_v32 = vadd.f32 %v598_v21, %v514_v53 }
 0x1a0   : > { %v902_v4 = vpop.permute.xlu0 %901 }
 0x1a1   : > { %v904_v2 = vpop.permute.xlu1 %903  ;;  %v931_v41 = vadd.f32 %v902_v4, %v846_v15 }
 0x1a2   : > { %1064 = vrot.lane.b32.xlu1 %v1035_v7, %s1816_s24  ;;  %v933_v19 = vadd.f32 %v904_v2, %v848_v54  ;;  %v911_v39 = vsel %vm592_vm2, %v902_v4, %v904_v2  ;;  %v849_v4 = vmul.f32 0.0, %v2258_v43 }
 0x1a3   : > { %1381 = vrot.lane.b32.xlu0 %v1342_v51, %s1817_s25 }
 0x1a4   : > { %v699_v46 = vpop.permute.xlu0 %698 }
 0x1a5   : > { %v701_v61 = vpop.permute.xlu1 %700 }
 0x1a6   : > { %v716_v31 = vsel %vm710_vm1, %v701_v61, %v2393_v10  ;;  %1383 = vrot.lane.b32.xlu1 %v1343_v62, %s1817_s25  ;;  %v513_v10 = vmul.f32 0.0, %v2241_v36  ;;  %v847_v36 = vmul.f32 %v2253_v40, %v2275_v50 }
 0x1a7   : > { %v739_v14 = vadd.f32 %v716_v31, %v621_v44  ;;  %v518_v44 = vmul.f32 %v2244_v37, %v2353_v34 }
 0x1a8   : > { %v2494_v58 = vpop.permute.xlu0 %1201  ;;  %v619_v18 = vadd.f32 %v597_v63, %v513_v10  ;;  %v932_v48 = vadd.f32 %v911_v39, %v847_v36 }
 0x1a9   : > { %v1204_v12 = vpop.permute.xlu1 %1203 }
 0x1aa   : > { %782 = vrot.lane.b32.xlu1 %v739_v14, %s1815_s23  ;;  %v1218_v49 = vsel %vm592_vm2, %v1204_v12, %v2399_v20  ;;  %v737_v55 = vadd.f32 %v699_v46, %v619_v18  ;;  %v517_v14 = vmul.f32 %v2244_v37, %v2333_v26 }
 0x1ab   : > { %v1241_v0 = vadd.f32 %v1218_v49, %v1136_v42 }
 0x1ac   : > { %v999_v9 = vpop.permute.xlu0 %998 }
 0x1ad   : > { %v1036_v45 = vadd.f32 %v999_v9, %v931_v41  ;;  %v1001_v1 = vpop.permute.xlu1 %1000 }
 0x1ae   : > { %v1015_v38 = vsel %vm710_vm1, %v1001_v1, %v2403_v23  ;;  %v715_v23 = vsel %vm710_vm1, %v699_v46, %v701_v61  ;;  %v1014_v17 = vsel %vm710_vm1, %v999_v9, %v1001_v1 }
 0x1af   : > { %v1038_v6 = vadd.f32 %v1015_v38, %v933_v19  ;;  %1066 = vrot.lane.b32.xlu0 %v1036_v45, %s1816_s24  ;;  %v738_v5 = vadd.f32 %v715_v23, %v620_v32  ;;  %v1037_v28 = vadd.f32 %v1014_v17, %v932_v48  ;;  %v851_v38 = vmul.f32 %v2258_v43, %v2353_v34 }
 0x1b0   : > { %v2511_v25 = vpop.permute.xlu0 %1306  ;;  %v1139_v32 = vmul.f32 %v2272_v52, %v2353_v34 }
 0x1b1   : > { %v1309_v20 = vpop.permute.xlu1 %1308  ;;  %1070 = vrot.lane.b32.xlu1 %v1038_v6, %s1816_s24 }
 0x1b2   : > { %v1323_v57 = vsel %vm710_vm1, %v1309_v20, %v2407_v33  ;;  %v1217_v33 = vsel %vm592_vm2, %v2494_v58, %v1204_v12  ;;  %v1322_v40 = vsel %vm710_vm1, %v2511_v25, %v1309_v20  ;;  %v516_v12 = vmul.f32 0.0, %v2244_v37 }
 0x1b3   : > { %v1346_v16 = vadd.f32 %v1323_v57, %v1241_v0  ;;  %778 = vrot.lane.b32.xlu0 %v737_v55, %s1815_s23  ;;  %v1240_v13 = vadd.f32 %v1217_v33, %v1135_v27  ;;  %v1138_v55 = vmul.f32 %v2272_v52, %v2333_v26  ;;  %v744_v27 = vlaneseq }
 0x1b4   : > { %v589_v59 = vpop.permute.xlu0 %588 }
 0x1b5   : > { %v705_v35 = vpop.permute.xlu1 %704  ;;  %1389 = vrot.lane.b32.xlu1 %v1346_v16, %s1817_s25  ;;  %v1345_v8 = vadd.f32 %v1322_v40, %v1240_v13  ;;  %v599_v61 = vsel %vm592_vm2, %v2383_v60, %v589_v59  ;;  %v850_v60 = vmul.f32 %v2258_v43, %v2333_v26  ;;  %v1134_v26 = vmul.f32 0.0, %v2269_v3 }
 0x1b6   : > { %v622_v10 = vadd.f32 %v599_v61, %v516_v12 }
 0x1b7   : > { %780 = vrot.lane.b32.xlu0 %v738_v5, %s1815_s23 }
 0x1b8   : > { %v906_v47 = vpop.permute.xlu0 %905 }
 0x1b9   : > { %v1208_v7 = vpop.permute.xlu1 %1207  ;;  %v934_v51 = vadd.f32 %v906_v47, %v849_v4 }
 0x1bb   : > { %1068 = vrot.lane.b32.xlu0 %v1037_v28, %s1816_s24  ;;  %v468_v28 = vld [vmem:[%s2715_s1] sm:$0x3] }
 0x1bc   : > { %v707_v2 = vpop.permute.xlu0 %706  ;;  %vm469_vm3 = vcmp.ge.s32.totalorder %v468_v28, 1  ;;  %vm470_vm4 = vcmp.lt.s32.totalorder %v468_v28, 15 }
 0x1bd   : > { %v1005_v30 = vpop.permute.xlu1 %1004  ;;  %v718_v63 = vsel %vm710_vm1, %v707_v2, %v2396_v29  ;;  %v717_v19 = vsel %vm710_vm1, %v705_v35, %v707_v2  ;;  %v740_v29 = vadd.f32 %v705_v35, %v622_v10  ;;  %v2733_v2 = vmov 0  }
 0x1be   : > { %v1039_v62 = vadd.f32 %v1005_v30, %v934_v51 }
 0x1bf   : > { %1387 = vrot.lane.b32.xlu0 %v1345_v8, %s1817_s25  ;;  %v743_v8 = vsel %vm469_vm3, 1, %v2733_v2 }
 0x1c0   : > { %1072 = vrot.lane.b32.xlu1 %v1039_v62, %s1816_s24  ;;  %v1210_v50 = vpop.permute.xlu0 %1209 }
 0x1c1   : > { %v1313_v46 = vpop.permute.xlu1 %1312  ;;  %v1219_v6 = vsel %vm592_vm2, %v1208_v7, %v1210_v50  ;;  %v1220_v20 = vsel %vm592_vm2, %v1210_v50, %v2401_v11  ;;  %v1239_v11 = vadd.f32 %v2494_v58, %v1134_v26 }
 0x1c2   : > { %v1243_v23 = vadd.f32 %v1219_v6, %v1138_v55  ;;  %v1244_v36 = vadd.f32 %v1220_v20, %v1139_v32 }
 0x1c3   : > { %v1344_v35 = vadd.f32 %v2511_v25, %v1239_v11 }
 0x1c4   : > { %v1007_v31 = vpop.permute.xlu0 %1006 }
 0x1c5   : > { %v591_v15 = vpop.permute.xlu1 %590  ;;  %v1016_v21 = vsel %vm710_vm1, %v1005_v30, %v1007_v31  ;;  %v1017_v57 = vsel %vm710_vm1, %v1007_v31, %v2405_v24  ;;  %v1137_v24 = vmul.f32 0.0, %v2272_v52  ;;  %v1350_v30 = vsel %vm470_vm4, 1, %v2733_v2 }
 0x1c6   : > { %v600_v41 = vsel %vm592_vm2, %v589_v59, %v591_v15  ;;  %v624_v54 = vadd.f32 %v591_v15, %v518_v44 }
 0x1c7   : > { %v623_v9 = vadd.f32 %v600_v41, %v517_v14  ;;  %v1242_v34 = vadd.f32 %v1208_v7, %v1137_v24  ;;  %v745_v7 = vshrl.u32 %v744_v27, 7 }
 0x1c8   : > { %v742_v45 = vadd.f32 %v718_v63, %v624_v54  ;;  %v1315_v18 = vpop.permute.xlu0 %1314 }
 0x1c9   : > { %v741_v1 = vadd.f32 %v717_v19, %v623_v9  ;;  %v908_v49 = vpop.permute.xlu1 %907  ;;  %v1324_v43 = vsel %vm710_vm1, %v1313_v46, %v1315_v18  ;;  %v1325_v39 = vsel %vm710_vm1, %v1315_v18, %v2409_v22  ;;  %v1347_v3 = vadd.f32 %v1313_v46, %v1242_v34  ;;  %v1479_v22 = vld [vmem:[%s2721_s7] sm:$0xff] }
 0x1ca   : > { %v912_v37 = vsel %vm592_vm2, %v906_v47, %v908_v49  ;;  %788 = vrot.lane.b32.xlu1 %v742_v45, %s1815_s23  ;;  %v936_v53 = vadd.f32 %v908_v49, %v851_v38  ;;  %v1348_v59 = vadd.f32 %v1324_v43, %v1243_v23  ;;  %v1349_v5 = vadd.f32 %v1325_v39, %v1244_v36 }
 0x1cb   : > { %v935_v42 = vadd.f32 %v912_v37, %v850_v60  ;;  %786 = vrot.lane.b32.xlu0 %v741_v1, %s1815_s23  ;;  %v746_v13 = vsub.s32 0, %v745_v7  ;;  %v750_v51 = vsub.s32 1, %v745_v7 }
 0x1cc   : > { %v1041_v16 = vadd.f32 %v1017_v57, %v936_v53 }
 0x1cd   : > { %v1040_v0 = vadd.f32 %v1016_v21, %v935_v42  ;;  %v2586_v46 = vrot.slane %v743_v8, %v746_v13  ;;  %v2588_v44 = vrot.slane %v743_v8, %v750_v51  ;;  %v2590_v61 = vrot.slane %v1350_v30, %v750_v51 }
 0x1ce   : > { %784 = vrot.lane.b32.xlu1 %v740_v29, %s1815_s23  ;;  %v2592_v31 = vrot.slane %v1350_v30, %v746_v13  ;;  %s298_s23 = scalar_lea.vmem [#allocation3], %s1642_s21 }
 0x1cf   : > { %1074 = vrot.lane.b32.xlu0 %v1040_v0, %s1816_s24  ;;  %vm752_vm8 = vcmp.eq.s32.totalorder %v2586_v46, 1  ;;  %vm753_vm9 = vcmp.eq.s32.totalorder %v2588_v44, 1  ;;  %vm1360_vm10 = vcmp.eq.s32.totalorder %v2590_v61, 1 }
 0x1d0   : > { %vm1359_vm11 = vcmp.eq.s32.totalorder %v2592_v31, 1  ;;  %v1478_v31 = vld [vmem:[%s2720_s6] sm:$0xff] }
 0x1d2   : > { %1076 = vrot.lane.b32.xlu1 %v1041_v16, %s1816_s24  ;;  %s1579_s24 = sshll.u32 %s298_s23, 4  ;;  %s2674_s24 = int_to_ptr.vmem [resolvable:$true] %s1579_s24 }
 0x1d3   : > { %1393 = vrot.lane.b32.xlu0 %v1348_v59, %s1817_s25  ;;  %s1747_s12 = scalar_lea.vmem %s2674_s24, 256 }
 0x1d4   : > { %p1748_p11 = scmp.ne.s32.totalorder %s2674_s24, %s1747_s12 }
 0x1d6   : > { %1395 = vrot.lane.b32.xlu1 %v1349_v5, %s1817_s25  ;;  %p1749_p12 = pnand %p1748_p11, %p1902_p5 }
 0x1d7   : > { %1385 = vrot.lane.b32.xlu0 %v1344_v35, %s1817_s25  ;;  %v2734_v35 = vld [vmem:[#allocation6_spill] sm:$0xff] }
 0x1d8   : > { %p1750_p13 = pneg %p1749_p12 }
 0x1da   : > { %1391 = vrot.lane.b32.xlu1 %v1347_v3, %s1817_s25 }
 0x1db   : > { %1482 = vperm.xlu0 %1743, %v1479_v22  }
 0x1eb   : > { %v771_v17 = vpop.permute.xlu1 %770 }
 0x1f1   : > { %v1055_v58 = vpop.permute.xlu0 %1054 }
 0x1f3   : > { %v1059_v52 = vpop.permute.xlu1 %1058 }
 0x1f5   : > { %v1374_v48 = vpop.permute.xlu0 %1373 }
 0x1f7   : > { %v1378_v25 = vpop.permute.xlu1 %1377 }
 0x1f9   : > { %v767_v33 = vpop.permute.xlu0 %766 }
 0x1fd   : > { %v769_v47 = vpop.permute.xlu0 %768 }
 0x1fe   : > { %v791_v12 = vsel %vm790_vm5, %v767_v33, %v769_v47  ;;  %v792_v41 = vsel %vm790_vm5, %v769_v47, %v771_v17 }
 0x1ff   : > { %v807_v60 = vsel %vm752_vm8, %v791_v12, 0.0  ;;  %v808_v49 = vsel %vm753_vm9, %v792_v41, 0.0 }
 0x201   : > { %v1057_v4 = vpop.permute.xlu0 %1056 }
 0x202   : > { %v1061_v40 = vpop.permute.xlu1 %1060  ;;  %v1080_v63 = vsel %vm1078_vm7, %v1057_v4, %v1059_v52  ;;  %v1079_v19 = vsel %vm1078_vm7, %v1055_v58, %v1057_v4 }
 0x203   : > { %v1096_v37 = vadd.f32 %v1080_v63, %v808_v49  ;;  %v1095_v6 = vadd.f32 %v1079_v19, %v807_v60 }
 0x205   : > { %v1376_v50 = vpop.permute.xlu0 %1375 }
 0x206   : > { %v1380_v62 = vpop.permute.xlu1 %1379  ;;  %v1399_v54 = vsel %vm1397_vm6, %v1376_v50, %v1378_v25  ;;  %v1398_v9 = vsel %vm1397_vm6, %v1374_v48, %v1376_v50 }
 0x207   : > { %v1415_v38 = vsel %vm1360_vm10, %v1399_v54, 0.0  ;;  %v1414_v18 = vsel %vm1359_vm11, %v1398_v9, 0.0 }
 0x208   : > { %v1423_v53 = vadd.f32 %v1415_v38, %v1096_v37  ;;  %v1422_v43 = vadd.f32 %v1414_v18, %v1095_v6 }
 0x20a   : > { %v1455_v11 = vadd.f32 %v2285_v56, %v1423_v53  ;;  %v1454_v5 = vadd.f32 %v2285_v56, %v1422_v43 }
 0x20c   : > { %v777_v14 = vpop.permute.xlu1 %776  ;;  %v1463_v17 = vmax.f32 %v1455_v11, 0.0  ;;  %v1462_v48 = vmax.f32 %v1454_v5, 0.0  ;;  %v2736_v5 = vld [vmem:[#allocation8_spill] sm:$0xff] }
 0x20d   : > { %v775_v15 = vpop.permute.xlu0 %774 }
 0x20e   : > { %v794_v55 = vsel %vm790_vm5, %v775_v15, %v777_v14  ;;  %v1471_v25 = vmin.f32 %v1463_v17, 6.0  ;;  %v1470_v28 = vmin.f32 %v1462_v48, 6.0 }
 0x20f   : > { %v810_v16 = vsel %vm753_vm9, %v794_v55, 0.0  ;;  %v2735_v55 = vld [vmem:[#allocation7_spill] sm:$0xff] }
 0x210   : > { %v773_v10 = vpop.permute.xlu1 %772 }
 0x211   : > { %v793_v45 = vsel %vm790_vm5, %v773_v10, %v775_v15  ;;  %v1063_v1 = vpop.permute.xlu0 %1062 }
 0x212   : > { %v809_v42 = vsel %vm752_vm8, %v793_v45, 0.0  ;;  %v1081_v29 = vsel %vm1078_vm7, %v1061_v40, %v1063_v1 }
 0x213   : > { %v1097_v20 = vadd.f32 %v1081_v29, %v809_v42 }
 0x214   : > { %v1065_v21 = vpop.permute.xlu1 %1064 }
 0x215   : > { %v1382_v0 = vpop.permute.xlu0 %1381  ;;  %v1082_v23 = vsel %vm1078_vm7, %v1063_v1, %v1065_v21 }
 0x216   : > { %v1400_v57 = vsel %vm1397_vm6, %v1380_v62, %v1382_v0  ;;  %v1098_v59 = vadd.f32 %v1082_v23, %v810_v16 }
 0x217   : > { %v1416_v32 = vsel %vm1359_vm11, %v1400_v57, 0.0 }
 0x218   : > { %v1424_v26 = vadd.f32 %v1416_v32, %v1097_v20  ;;  %v1384_v39 = vpop.permute.xlu1 %1383 }
 0x219   : > { %v1401_v36 = vsel %vm1397_vm6, %v1382_v0, %v1384_v39 }
 0x21a   : > { %v1417_v24 = vsel %vm1360_vm10, %v1401_v36, 0.0  ;;  %v1456_v34 = vadd.f32 %v2734_v35, %v1424_v26 }
 0x21b   : > { %v1425_v3 = vadd.f32 %v1417_v24, %v1098_v59 }
 0x21c   : > { %v1464_v22 = vmax.f32 %v1456_v34, 0.0  ;;  %v783_v56 = vpop.permute.xlu1 %782 }
 0x21d   : > { %v1457_v58 = vadd.f32 %v2734_v35, %v1425_v3 }
 0x21e   : > { %v1472_v33 = vmin.f32 %v1464_v22, 6.0 }
 0x21f   : > { %v1465_v52 = vmax.f32 %v1457_v58, 0.0 }
 0x220   : > { %v1691_v40 = vpack.c.bf16 %v1472_v33, %v1470_v28 }
 0x221   : > { %v1067_v47 = vpop.permute.xlu0 %1066  ;;  %v1473_v27 = vmin.f32 %v1465_v52, 6.0 }
 0x223   : > { %v1689_v7 = vpack.c.bf16 %v1473_v27, %v1471_v25  ;;  %v1071_v51 = vpop.permute.xlu1 %1070 }
 0x225   : > { %1690 = vmatprep.subr.bf16.mxu1 %v1689_v7  ;;  %v779_v4 = vpop.permute.xlu0 %778 }
 0x226   : > { %1692 = vmatpush1.bf16.msra.mxu1 %v1691_v40 }
 0x227   : > { %v1390_v8 = vpop.permute.xlu1 %1389 }
 0x229   : > { %v781_v13 = vpop.permute.xlu0 %780 }
 0x22a   : > { %v796_v15 = vsel %vm790_vm5, %v781_v13, %v783_v56  ;;  %v795_v1 = vsel %vm790_vm5, %v779_v4, %v781_v13 }
 0x22b   : > { %v812_v9 = vsel %vm753_vm9, %v796_v15, 0.0  ;;  %v811_v29 = vsel %vm752_vm8, %v795_v1, 0.0 }
 0x22d   : > { %v1069_v2 = vpop.permute.xlu0 %1068 }
 0x22e   : > { %v1084_v41 = vsel %vm1078_vm7, %v1069_v2, %v1071_v51  ;;  %v1083_v37 = vsel %vm1078_vm7, %v1067_v47, %v1069_v2  ;;  %v1745_v51 = vld [vmem:[%s1931_s13] sm:$0xff] }
 0x22f   : > { %v1100_v19 = vadd.f32 %v1084_v41, %v812_v9  ;;  %v1099_v53 = vadd.f32 %v1083_v37, %v811_v29 }
 0x231   : > { %v1388_v62 = vpop.permute.xlu0 %1387 }
 0x232   : > { %v1073_v30 = vpop.permute.xlu1 %1072  ;;  %v1403_v12 = vsel %vm1397_vm6, %v1388_v62, %v1390_v8  ;;  %v1746_v8 = vld [vmem:[%s1931_s13 + $0x8] sm:$0xff]  ;;  %s1818_s13 = smov [#allocation3]  }
 0x233   : > { %v1419_v10 = vsel %vm1360_vm10, %v1403_v12, 0.0  ;;  %s1751_s17 = sshll.u32 %s1818_s13, 4  ;;  %s1752_s17 = int_to_ptr.vmem [resolvable:$false] %s1751_s17 }
 0x234   : > { %v1427_v60 = vadd.f32 %v1419_v10, %v1100_v19  ;;  %s1753_s18 = scalar_lea.vmem %s1752_s17, 512  ;;  %p1754_p0 = scmp.lt.s32.totalorder %s2674_s24, %s1752_s17 }
 0x235   : > { %p1755_p1 = scmp.lt.s32.totalorder %s1753_s18, %s1747_s12 }
 0x236   : > { %v1459_v0 = vadd.f32 %v2735_v55, %v1427_v60 }
 0x237   : > { %p1756_p2 = por %p1755_p1, %p1754_p0 }
 0x238   : > { %v1467_v11 = vmax.f32 %v1459_v0, 0.0 }
 0x239   : > { %p1757_p3 = pnand %p1756_p2, %p1750_p13 }
 0x23a   : > { %v1475_v48 = vmin.f32 %v1467_v11, 6.0 }
 0x23c   : > { %v789_v50 = vpop.permute.xlu1 %788 }
 0x23d   : > { %v787_v14 = vpop.permute.xlu0 %786 }
 0x23e   : > { %v798_v49 = vsel %vm790_vm5, %v787_v14, %v789_v50 }
 0x23f   : > { %v814_v6 = vsel %vm753_vm9, %v798_v49, 0.0 }
 0x240   : > { %v785_v54 = vpop.permute.xlu1 %784 }
 0x241   : > { %v1075_v63 = vpop.permute.xlu0 %1074  ;;  %v797_v42 = vsel %vm790_vm5, %v785_v54, %v787_v14 }
 0x242   : > { %v813_v57 = vsel %vm752_vm8, %v797_v42, 0.0  ;;  %v1085_v32 = vsel %vm1078_vm7, %v1073_v30, %v1075_v63 }
 0x243   : > { %v1101_v24 = vadd.f32 %v1085_v32, %v813_v57 }
 0x244   : > { %v1077_v45 = vpop.permute.xlu1 %1076 }
 0x245   : > { %v1394_v38 = vpop.permute.xlu0 %1393  ;;  %v1086_v18 = vsel %vm1078_vm7, %v1075_v63, %v1077_v45 }
 0x246   : > { %v1102_v43 = vadd.f32 %v1086_v18, %v814_v6 }
 0x248   : > { %v1396_v21 = vpop.permute.xlu1 %1395 }
 0x249   : > { %v1405_v20 = vsel %vm1397_vm6, %v1394_v38, %v1396_v21  ;;  %v1386_v23 = vpop.permute.xlu0 %1385 }
 0x24a   : > { %v1421_v16 = vsel %vm1360_vm10, %v1405_v20, 0.0  ;;  %v1402_v26 = vsel %vm1397_vm6, %v1386_v23, %v1388_v62 }
 0x24b   : > { %v1429_v44 = vadd.f32 %v1421_v16, %v1102_v43  ;;  %v1418_v39 = vsel %vm1359_vm11, %v1402_v26, 0.0 }
 0x24c   : > { %v1426_v59 = vadd.f32 %v1418_v39, %v1099_v53  ;;  %v1392_v36 = vpop.permute.xlu1 %1391 }
 0x24d   : > { %v1461_v35 = vadd.f32 %v2736_v5, %v1429_v44  ;;  %v1404_v46 = vsel %vm1397_vm6, %v1392_v36, %v1394_v38 }
 0x24e   : > { %v1458_v34 = vadd.f32 %v2735_v55, %v1426_v59  ;;  %v1420_v61 = vsel %vm1359_vm11, %v1404_v46, 0.0 }
 0x24f   : > { %v1469_v3 = vmax.f32 %v1461_v35, 0.0  ;;  %v1428_v22 = vadd.f32 %v1420_v61, %v1101_v24 }
 0x250   : > { %v1466_v58 = vmax.f32 %v1458_v34, 0.0 }
 0x251   : > { %v1460_v17 = vadd.f32 %v2736_v5, %v1428_v22  ;;  %v1477_v52 = vmin.f32 %v1469_v3, 6.0 }
 0x252   : > { %v1474_v25 = vmin.f32 %v1466_v58, 6.0 }
 0x253   : > { %v1468_v33 = vmax.f32 %v1460_v17, 0.0  ;;  %v1693_v47 = vpack.c.bf16 %v1477_v52, %v1475_v48 }
 0x255   : > { %1694 = vmatprep.subr.bf16.mxu1 %v1693_v47  ;;  %v1476_v27 = vmin.f32 %v1468_v33, 6.0 }
 0x257   : > { %v1695_v28 = vpack.c.bf16 %v1476_v27, %v1474_v25 }
 0x259   : > { %1696 = vmatpush1.bf16.msra.mxu1 %v1695_v28 }
 0x25a   : > { %v1483_v7 = vpop.permute.xlu0 %1482 }
 0x25c   : > { %1681 = vmatmul.mubr.msk.f32.vlgmr.msra.gmra.mrb[0].mxu1 %vm1485_vm12, %v1478_v31 }
 0x32f   : > { %v1555_v40 = vpop.f32.mrb[0].mxu1 }
 0x330   : > { %v1556_v4 = vadd.f32 %v1555_v40, %v1483_v7  ;;  %v1557_v56 = vpop.f32.mrb[1].mxu1 }
 0x331   : > { %v1558_v13 = vadd.f32 %v1557_v56, %v1483_v7 }
 0x332   : > { %v1560_v2 = vadd.f32 %v1745_v51, %v1556_v4 }
 0x333   : > { %v1561_v30 = vadd.f32 %v1746_v8, %v1558_v13 }
 0x334   : > { %1562 = vst [vmem:[%s298_s23] sm:$0xff] %v1560_v2 }
 0x335   : > { %1563 = vst [vmem:[%s298_s23 + $0x8] sm:$0xff] %v1561_v30 }
 0x336   : > { %1760 = shalt.err (!%p1757_p3)
}
 0x337   : > { %s1761_s19 = scalar_lea.hbm %s2672_s10, 256  ;;  %s1765_s22 = scalar_lea.hbm %s2722_s8, 512 }
 0x338   : > { %p1762_p4 = scmp.ne.s32.totalorder %s2672_s10, %s1761_s19  ;;  %p1766_p9 = scmp.lt.u32.totalorder %s2672_s10, %s2722_s8 }
 0x339   : > { %p1767_p10 = scmp.lt.u32.totalorder %s1765_s22, %s1761_s19  ;;  %p1769_p12 = scmp.lt.u32.totalorder %s1761_s19, %s2672_s10 }
 0x33a   : > { %p1763_p7 = pnand %p1762_p4, %p1902_p5 }
 0x33b   : > { %p1768_p11 = por %p1767_p10, %p1766_p9 }
 0x33c   : > { %p1764_p8 = pneg %p1763_p7 }
 0x33d   : > { %p1770_p13 = por %p1769_p12, %p1768_p11 }
 0x33f   : > { %p1771_p0 = pnand %p1770_p13, %p1764_p8 }
 0x341   : > { %1774 = shalt.err (!%p1771_p0)
}
 0x342   : > { %1697 = dma.vmem_to_hbm [thread:$0]  (%p1902_p5), %s2674_s24, 256, %s2672_s10, %s1565_s9  }
 0x343 PF: > { %p1703_p1 = scmp.ge.s32.totalorder %s1809_s30, 2  ;;  %s1591_s26 = sand.u32 1, %s1797_s27  }
 0x344   : > { %s1592_s12 = scalar_lea.sflag [#allocation4], %s1591_s26 }
 0x345   : > { %p1700_p2 = pnand %p1703_p1, %p1906_p6 }
 0x347   : > { %1792 = dma.done.wait (!%p1700_p2), %s1592_s12, 256  }
 0x348   : > { %1794 = vsyncadd (!%p1700_p2), %s1592_s12, 4294967040  ;;  %p18_p3 = scmp.ge.s32.totalorder %s1889_s11, 4   ;;  %s2737_s27 = smov %s1801_s28 }
 0x349   : > { %s2738_s28 = smov %s1805_s29  ;;  %s2739_s29 = smov %s1900_s14 }
 0x34a   : > { %s2740_s30 = smov %s1889_s11  ;;  %20 = sbr.rel (!%p18_p3) target bundleno = 3 (0x3), region = 95 }
 0x351   :  { %1597 = vsyncpa [#allocation4], 1 }
 0x352   :  { %1599 = vsyncpa [#allocation4 + $0x1], 1 }

</bundles_post_ra>
